<compile_context>
chip_gen: v6e
topology: v6e:2x2x1
jax: 0.10.0
libtpu: 0.0.40
codegen_flags: <defaults>
</compile_context>

<pallas_src>
import jax
import jax.numpy as jnp
from jax.experimental import pallas as pl
from jax.experimental.pallas import tpu as pltpu

# ---------------- synthetic "params" (module __init__ hyper-parameters) -----
VOCAB        = 50    # num_embeddings
TEXT_DIM     = 32    # params.text_dim
TEXT_HIDDEN  = 32    # params.text_gru_hidden_dim (1-layer unidirectional GRU)
AUDIO_DIM    = 16    # params.audio_dim (averaged acoustic features)
GENDER_EMB   = 4     # params.gender_emb_dim
NUM_TASKS    = 5
FC_HIDDEN    = 48    # params.fc_hidden_dim (base fc1)
BASE_OUT     = 32    # params.output_dim (base output == pred-layer input)
FINAL_HIDDEN = 32    # params.final_hidden_dim (PredictionLayer fc1)
OUTPUT_DIMS  = (4, 3, 2, 5, 7)   # params.output_{0..4}_dim

FEAT_DIM = AUDIO_DIM + TEXT_HIDDEN + GENDER_EMB      # 52
DUP_DIM  = FEAT_DIM * (NUM_TASKS + 1)                # 312 (only used by reference)
OUT_PAD  = 128                                       # lane-dense output slab

# ---- packed-slab layout (all row offsets are multiples of 8, lane-dense) ----
BATCH_TILE = 8          # time-major token rows per step (sublane tile)
GATE_BLK   = 128        # one 128-lane block per GRU gate (no lane rotates)
GRU_W      = 3 * GATE_BLK

# GRU slab (GRU_ROWS, 384): [pre-projected emb table | W_h | b_h]
PROJ_R0  = 0
WH_R0    = 56
BH_R0    = 88
GRU_ROWS = 96

# MLP slab (MLP_ROWS, 128): dup-folded fc1 (acoustic/text rows), gender+b1
# table, fc2, prediction-layer fc1/fc2 (all zero-padded to 128 lanes).
W1AC_R0  = 0
W1TX_R0  = 16
GCON_R0  = 48
W2_R0    = 56
B2_R0    = 104
WP1_R0   = 112
BP1_R0   = 144
WP2_R0   = 152
BP2_R0   = 184
MLP_ROWS = 192


def _vmem():
    return pl.BlockSpec(memory_space=pltpu.MemorySpace.VMEM)


# --------------------------- fused forward kernel ---------------------------
def fused_forward_kernel(
    tok_ref,     # (T*8, 1) int32 tokens, time-major, batch padded to 8/step
    gen_ref,     # (B, 1)   int32 gender ids
    len_ref,     # (B, 1)   int32 sequence lengths
    ac_ref,      # (B, AUDIO_DIM) f32 averaged acoustic features
    gru_ref,     # (GRU_ROWS, 384) f32 packed GRU slab
    mlp_ref,     # (MLP_ROWS, 128) f32 packed MLP slab
    out_ref,     # (B, OUT_PAD) f32
):
    B = len_ref.shape[0]
    TB = tok_ref.shape[0]
    T = TB // BATCH_TILE
    H = TEXT_HIDDEN

    # Token gather for ALL timesteps as one one-hot MXU matmul against the
    # pre-projected embedding table (W_i x + b_i per gate, 128-lane gate blocks).
    tok = tok_ref[...]                                                  # (T*8, 1)
    onehot = (jax.lax.broadcasted_iota(jnp.int32, (TB, VOCAB), 1)
              == tok).astype(jnp.float32)                               # (T*8, V)
    x_all = jnp.dot(onehot, gru_ref[PROJ_R0:PROJ_R0 + VOCAB, :],
                    preferred_element_type=jnp.float32)                 # (T*8, 384)

    wh = gru_ref[WH_R0:WH_R0 + H, :]                                    # (H, 384)
    bh = gru_ref[BH_R0:BH_R0 + 1, :]                                    # (1, 384)

    # Recurrence-independent MLP pre-work (gender one-hot gather + acoustic fc1
    # term; fc1 bias already folded into the gender table) -- issued before the
    # loop so it hides under the serial GRU chain.
    gen = gen_ref[...]                                                  # (B, 1)
    g_onehot = (jax.lax.broadcasted_iota(jnp.int32, (B, 3), 1)
                == gen).astype(jnp.float32)                             # (B, 3)
    pre = (jnp.dot(g_onehot, mlp_ref[GCON_R0:GCON_R0 + 3, :],
                   preferred_element_type=jnp.float32)
           + jnp.dot(ac_ref[...], mlp_ref[W1AC_R0:W1AC_R0 + AUDIO_DIM, :],
                     preferred_element_type=jnp.float32))               # (B, 128)

    # pack_padded_sequence emulation: per-step keep masks, one int compare.
    step_idx = jax.lax.broadcasted_iota(jnp.int32, (T, B, H), 0)
    keep = len_ref[...][None, :, :] > step_idx                          # (T, B, H)

    # ---- GRU recurrence (fully unrolled; T small & static) ----
    h = jnp.zeros((B, H), jnp.float32)
    for t in range(T):
        x_t = x_all[t * BATCH_TILE: t * BATCH_TILE + B]                 # (B, 384)
        hh = jnp.dot(h, wh, preferred_element_type=jnp.float32) + bh    # (B, 384)
        r = jax.nn.sigmoid(x_t[:, 0:H] + hh[:, 0:H])
        z = jax.nn.sigmoid(x_t[:, GATE_BLK:GATE_BLK + H]
                           + hh[:, GATE_BLK:GATE_BLK + H])
        n = jnp.tanh(x_t[:, 2 * GATE_BLK:2 * GATE_BLK + H]
                     + r * hh[:, 2 * GATE_BLK:2 * GATE_BLK + H])
        h_new = (1.0 - z) * n + z * h
        h = jnp.where(keep[t], h_new, h)

    # ---- base MLP (duplication + concat folded into fc1 at prep time) ----
    z1 = pre + jnp.dot(h, mlp_ref[W1TX_R0:W1TX_R0 + H, :],
                       preferred_element_type=jnp.float32)              # (B, 128)
    base = jnp.tanh(z1)
    z2 = (jnp.dot(base[:, :FC_HIDDEN], mlp_ref[W2_R0:W2_R0 + FC_HIDDEN, :],
                  preferred_element_type=jnp.float32)
          + mlp_ref[B2_R0:B2_R0 + 1, :])
    base = jnp.tanh(z2)

    # ---- PredictionLayer (eval: dropout identity; get_prob_dist=False) ----
    pen = jax.nn.relu(
        jnp.dot(base[:, :BASE_OUT], mlp_ref[WP1_R0:WP1_R0 + BASE_OUT, :],
                preferred_element_type=jnp.float32)
        + mlp_ref[BP1_R0:BP1_R0 + 1, :])
    out_ref[...] = (
        jnp.dot(pen[:, :FINAL_HIDDEN], mlp_ref[WP2_R0:WP2_R0 + FINAL_HIDDEN, :],
                preferred_element_type=jnp.float32)
        + mlp_ref[BP2_R0:BP2_R0 + 1, :])


# ------------------------------ parameters ----------------------------------
def init_params(key):
    """Parameters in the original (PyTorch-shaped) layout."""
    ks = jax.random.split(key, 12 + 4 * NUM_TASKS)
    s = 0.1
    n = jax.random.normal
    p = {
        "embedding":        s * n(ks[0], (VOCAB, TEXT_DIM), jnp.float32),
        "gender_embedding": s * n(ks[1], (3, GENDER_EMB), jnp.float32),
        "gru_w_i":          s * n(ks[2], (3, TEXT_DIM, TEXT_HIDDEN), jnp.float32),
        "gru_w_h":          s * n(ks[3], (3, TEXT_HIDDEN, TEXT_HIDDEN), jnp.float32),
        "gru_b_i":          s * n(ks[4], (3, 1, TEXT_HIDDEN), jnp.float32),
        "gru_b_h":          s * n(ks[5], (3, 1, TEXT_HIDDEN), jnp.float32),
        "base_fc1_w":       s * n(ks[6], (DUP_DIM, FC_HIDDEN), jnp.float32),
        "base_fc1_b":       s * n(ks[7], (1, FC_HIDDEN), jnp.float32),
        "base_fc2_w":       s * n(ks[8], (FC_HIDDEN, BASE_OUT), jnp.float32),
        "base_fc2_b":       s * n(ks[9], (1, BASE_OUT), jnp.float32),
    }
    for t, od in enumerate(OUTPUT_DIMS):
        k0, k1, k2, k3 = ks[12 + 4 * t: 16 + 4 * t]
        p[f"task{t}_fc1_w"] = s * n(k0, (BASE_OUT, FINAL_HIDDEN), jnp.float32)
        p[f"task{t}_fc1_b"] = s * n(k1, (1, FINAL_HIDDEN), jnp.float32)
        p[f"task{t}_fc2_w"] = s * n(k2, (FINAL_HIDDEN, od), jnp.float32)
        p[f"task{t}_fc2_b"] = s * n(k3, (1, od), jnp.float32)
    return p


def prepare_kernel_params(p, task_num):
    """One-time (per task) weight re-layout: embedding pre-projection, gate-block
    packing, duplication/bias folding, and coalescing into two lane-dense slabs."""
    H = TEXT_HIDDEN

    # ---- GRU slab: pre-projected emb table | gate-padded W_h | gate-padded b_h
    gru_slab = jnp.zeros((GRU_ROWS, GRU_W), jnp.float32)
    for g in range(3):                                   # gate order: r, z, n
        c0 = g * GATE_BLK
        proj_g = p["embedding"] @ p["gru_w_i"][g] + p["gru_b_i"][g]     # (V, H)
        gru_slab = gru_slab.at[PROJ_R0:PROJ_R0 + VOCAB, c0:c0 + H].set(proj_g)
        gru_slab = gru_slab.at[WH_R0:WH_R0 + H, c0:c0 + H].set(p["gru_w_h"][g])
        gru_slab = gru_slab.at[BH_R0, c0:c0 + H].set(p["gru_b_h"][g][0])

    # ---- duplication folding: dup_feats @ W1 == feats @ (W1[general] + W1[slot])
    w1 = p["base_fc1_w"]
    w1_eff = (w1[0:FEAT_DIM]
              + w1[(task_num + 1) * FEAT_DIM:(task_num + 2) * FEAT_DIM])
    w1_ac = w1_eff[:AUDIO_DIM]
    w1_tx = w1_eff[AUDIO_DIM:AUDIO_DIM + H]
    w1_gd = w1_eff[AUDIO_DIM + H:]
    gcon = p["gender_embedding"] @ w1_gd + p["base_fc1_b"]   # (3, FC) with b1 folded

    od = OUTPUT_DIMS[task_num]
    mlp_slab = jnp.zeros((MLP_ROWS, 128), jnp.float32)
    mlp_slab = mlp_slab.at[W1AC_R0:W1AC_R0 + AUDIO_DIM, :FC_HIDDEN].set(w1_ac)
    mlp_slab = mlp_slab.at[W1TX_R0:W1TX_R0 + H, :FC_HIDDEN].set(w1_tx)
    mlp_slab = mlp_slab.at[GCON_R0:GCON_R0 + 3, :FC_HIDDEN].set(gcon)
    mlp_slab = mlp_slab.at[W2_R0:W2_R0 + FC_HIDDEN, :BASE_OUT].set(p["base_fc2_w"])
    mlp_slab = mlp_slab.at[B2_R0, :BASE_OUT].set(p["base_fc2_b"][0])
    mlp_slab = mlp_slab.at[WP1_R0:WP1_R0 + BASE_OUT, :FINAL_HIDDEN].set(
        p[f"task{task_num}_fc1_w"])
    mlp_slab = mlp_slab.at[BP1_R0, :FINAL_HIDDEN].set(p[f"task{task_num}_fc1_b"][0])
    mlp_slab = mlp_slab.at[WP2_R0:WP2_R0 + FINAL_HIDDEN, :od].set(
        p[f"task{task_num}_fc2_w"])
    mlp_slab = mlp_slab.at[BP2_R0, :od].set(p[f"task{task_num}_fc2_b"][0])

    return {"gru_slab": gru_slab, "mlp_slab": mlp_slab, "out_dim": od}


# ------------------------------ forward --------------------------------------
def multitask_duplicate_input_forward(kp, acoustic_input, text_input,
                                      length_input, gender_input, task_num=0):
    """multi_dataset=True path: only the task_num predictor is evaluated."""
    B, T = text_input.shape
    assert B <= BATCH_TILE, "kernel assumes batch fits in one sublane tile"

    # time-major token column, batch padded to one sublane tile per step so the
    # per-step slice of the one-hot-gathered projections is tile-aligned
    tok = jnp.zeros((T, BATCH_TILE), jnp.int32).at[:, :B].set(
        text_input.T.astype(jnp.int32))
    tok_col = tok.reshape(T * BATCH_TILE, 1)
    len_col = length_input.astype(jnp.int32)[:, None]            # (B, 1)
    gen_col = gender_input.astype(jnp.int32)[:, None]             # (B, 1)

    out_pad = pl.pallas_call(
        fused_forward_kernel,
        out_shape=jax.ShapeDtypeStruct((B, OUT_PAD), jnp.float32),
        in_specs=[_vmem()] * 6,
        out_specs=_vmem(),
    )(tok_col, gen_col, len_col, acoustic_input.astype(jnp.float32),
      kp["gru_slab"], kp["mlp_slab"])

    task_out = out_pad[:, :kp["out_dim"]]
    outs = [None] * NUM_TASKS
    outs[task_num] = task_out
    return tuple(outs)


# ---------------------- pure-JAX reference (unfused) -------------------------
def _reference_forward(p, acoustic, text, lengths, gender, task_num):
    emb = jnp.take(p["embedding"], text, axis=0)              # (B, T, E)
    B, T, _ = emb.shape
    H = TEXT_HIDDEN
    h = jnp.zeros((B, H), jnp.float32)
    for t in range(T):
        x = emb[:, t, :]
        r = jax.nn.sigmoid(x @ p["gru_w_i"][0] + p["gru_b_i"][0]
                           + h @ p["gru_w_h"][0] + p["gru_b_h"][0])
        z = jax.nn.sigmoid(x @ p["gru_w_i"][1] + p["gru_b_i"][1]
                           + h @ p["gru_w_h"][1] + p["gru_b_h"][1])
        n = jnp.tanh(x @ p["gru_w_i"][2] + p["gru_b_i"][2]
                     + r * (h @ p["gru_w_h"][2] + p["gru_b_h"][2]))
        h_new = (1.0 - z) * n + z * h
        h = jnp.where((t < lengths)[:, None], h_new, h)
    g = jnp.take(p["gender_embedding"], gender, axis=0)
    feats = jnp.concatenate([acoustic, h, g], axis=1)
    parts = [feats] + [feats if i == task_num else jnp.zeros_like(feats)
                       for i in range(NUM_TASKS)]
    dup = jnp.concatenate(parts, axis=1)
    base = jnp.tanh(dup @ p["base_fc1_w"] + p["base_fc1_b"])
    base = jnp.tanh(base @ p["base_fc2_w"] + p["base_fc2_b"])
    pen = jax.nn.relu(base @ p[f"task{task_num}_fc1_w"] + p[f"task{task_num}_fc1_b"])
    return pen @ p[f"task{task_num}_fc2_w"] + p[f"task{task_num}_fc2_b"]


# ------------------------------ main ------------------------------------------
if __name__ == "__main__":
    key = jax.random.PRNGKey(0)
    p_key, a_key, t_key = jax.random.split(key, 3)

    params = init_params(p_key)
    task_num = 0
    kparams = prepare_kernel_params(params, task_num)

    B, T = 2, 8
    acoustic_input = jax.random.normal(a_key, (B, AUDIO_DIM), jnp.float32)
    text_input = jax.random.randint(t_key, (B, T), 1, VOCAB, dtype=jnp.int32)
    length_input = jnp.array([8, 5], dtype=jnp.int32)
    gender_input = jnp.array([1, 2], dtype=jnp.int32)

    outs = multitask_duplicate_input_forward(
        kparams, acoustic_input, text_input, length_input, gender_input,
        task_num=task_num)

    task_0_out = jax.block_until_ready(outs[0])
    assert task_0_out.shape == (B, OUTPUT_DIMS[task_num])
    assert all(o is None for o in outs[1:])

    ref = _reference_forward(params, acoustic_input, text_input,
                             length_input, gender_input, task_num)
    assert jnp.allclose(task_0_out, ref, atol=5e-4, rtol=5e-3), \
        (task_0_out, ref)

    print("KERNEL_OK")
</pallas_src>

<mosaic_0001>
module attributes {stable_mosaic.version = 11 : i64} {
  func.func @fused_forward_kernel(%arg0: memref<64x1xi32, #tpu.memory_space<vmem>>, %arg1: memref<2x1xi32, #tpu.memory_space<vmem>>, %arg2: memref<2x1xi32, #tpu.memory_space<vmem>>, %arg3: memref<2x16xf32, #tpu.memory_space<vmem>>, %arg4: memref<96x384xf32, #tpu.memory_space<vmem>>, %arg5: memref<192x128xf32, #tpu.memory_space<vmem>>, %arg6: memref<2x128xf32, #tpu.memory_space<vmem>>) attributes {dimension_semantics = [], scalar_prefetch = 0 : i64, scratch_operands = 0 : i64, tpu.core_type = #tpu.core_type<tc>} {
    %c0 = arith.constant 0 : index
    %c0_0 = arith.constant 0 : index
    %0 = vector.load %arg0[%c0, %c0_0] : memref<64x1xi32, #tpu.memory_space<vmem>>, vector<64x1xi32>
    %1 = tpu.iota {dimensions = array<i32: 1>} : vector<64x50xi32>
    %2 = vector.broadcast %0 : vector<64x1xi32> to vector<64x50xi32>
    %3 = arith.cmpi eq, %1, %2 : vector<64x50xi32>
    %4 = arith.extui %3 : vector<64x50xi1> to vector<64x50xi32>
    %5 = arith.sitofp %4 : vector<64x50xi32> to vector<64x50xf32>
    %c0_1 = arith.constant 0 : index
    %c0_2 = arith.constant 0 : index
    %6 = vector.load %arg4[%c0_1, %c0_2] : memref<96x384xf32, #tpu.memory_space<vmem>>, vector<50x384xf32>
    %cst = arith.constant dense<0.000000e+00> : vector<64x384xf32>
    %7 = tpu.matmul %5, %6, %cst {dimension_numbers = #tpu.dot_dimension_numbers<[1], [0], [0], [1], [0, 0, 1, 1], [], []>} : vector<64x50xf32>, vector<50x384xf32>, vector<64x384xf32> -> vector<64x384xf32>
    %c56 = arith.constant 56 : index
    %c0_3 = arith.constant 0 : index
    %8 = vector.load %arg4[%c56, %c0_3] : memref<96x384xf32, #tpu.memory_space<vmem>>, vector<32x384xf32>
    %c88 = arith.constant 88 : index
    %c0_4 = arith.constant 0 : index
    %9 = vector.load %arg4[%c88, %c0_4] : memref<96x384xf32, #tpu.memory_space<vmem>>, vector<1x384xf32>
    %c0_5 = arith.constant 0 : index
    %c0_6 = arith.constant 0 : index
    %10 = vector.load %arg1[%c0_5, %c0_6] : memref<2x1xi32, #tpu.memory_space<vmem>>, vector<2x1xi32>
    %11 = tpu.iota {dimensions = array<i32: 1>} : vector<2x3xi32>
    %12 = vector.broadcast %10 : vector<2x1xi32> to vector<2x3xi32>
    %13 = arith.cmpi eq, %11, %12 : vector<2x3xi32>
    %14 = arith.extui %13 : vector<2x3xi1> to vector<2x3xi32>
    %15 = arith.sitofp %14 : vector<2x3xi32> to vector<2x3xf32>
    %c48 = arith.constant 48 : index
    %c0_7 = arith.constant 0 : index
    %16 = vector.load %arg5[%c48, %c0_7] : memref<192x128xf32, #tpu.memory_space<vmem>>, vector<3x128xf32>
    %cst_8 = arith.constant dense<0.000000e+00> : vector<2x128xf32>
    %17 = tpu.matmul %15, %16, %cst_8 {dimension_numbers = #tpu.dot_dimension_numbers<[1], [0], [0], [1], [0, 0, 1, 1], [], []>} : vector<2x3xf32>, vector<3x128xf32>, vector<2x128xf32> -> vector<2x128xf32>
    %c0_9 = arith.constant 0 : index
    %c0_10 = arith.constant 0 : index
    %18 = vector.load %arg3[%c0_9, %c0_10] : memref<2x16xf32, #tpu.memory_space<vmem>>, vector<2x16xf32>
    %c0_11 = arith.constant 0 : index
    %c0_12 = arith.constant 0 : index
    %19 = vector.load %arg5[%c0_11, %c0_12] : memref<192x128xf32, #tpu.memory_space<vmem>>, vector<16x128xf32>
    %cst_13 = arith.constant dense<0.000000e+00> : vector<2x128xf32>
    %20 = tpu.matmul %18, %19, %cst_13 {dimension_numbers = #tpu.dot_dimension_numbers<[1], [0], [0], [1], [0, 0, 1, 1], [], []>} : vector<2x16xf32>, vector<16x128xf32>, vector<2x128xf32> -> vector<2x128xf32>
    %21 = arith.addf %17, %20 : vector<2x128xf32>
    %22 = tpu.iota {dimensions = array<i32: 0>} : vector<8x2x32xi32>
    %c0_14 = arith.constant 0 : index
    %c0_15 = arith.constant 0 : index
    %23 = vector.load %arg2[%c0_14, %c0_15] : memref<2x1xi32, #tpu.memory_space<vmem>>, vector<2x1xi32>
    %24 = vector.shape_cast %23 : vector<2x1xi32> to vector<1x2x1xi32>
    %25 = vector.broadcast %24 : vector<1x2x1xi32> to vector<8x2x32xi32>
    %26 = arith.cmpi sgt, %25, %22 : vector<8x2x32xi32>
    %cst_16 = arith.constant 0.000000e+00 : f32
    %27 = vector.broadcast %cst_16 : f32 to vector<2x32xf32>
    %28 = vector.extract_strided_slice %7 {offsets = [0, 0], sizes = [2, 384], strides = [1, 1]} : vector<64x384xf32> to vector<2x384xf32>
    %cst_17 = arith.constant dense<0.000000e+00> : vector<2x384xf32>
    %29 = tpu.matmul %27, %8, %cst_17 {dimension_numbers = #tpu.dot_dimension_numbers<[1], [0], [0], [1], [0, 0, 1, 1], [], []>} : vector<2x32xf32>, vector<32x384xf32>, vector<2x384xf32> -> vector<2x384xf32>
    %30 = vector.broadcast %9 : vector<1x384xf32> to vector<2x384xf32>
    %31 = arith.addf %29, %30 : vector<2x384xf32>
    %32 = vector.extract_strided_slice %28 {offsets = [0, 0], sizes = [2, 32], strides = [1, 1]} : vector<2x384xf32> to vector<2x32xf32>
    %33 = vector.extract_strided_slice %31 {offsets = [0, 0], sizes = [2, 32], strides = [1, 1]} : vector<2x384xf32> to vector<2x32xf32>
    %34 = arith.addf %32, %33 : vector<2x32xf32>
    %35 = arith.negf %34 : vector<2x32xf32>
    %36 = math.exp %35 : vector<2x32xf32>
    %cst_18 = arith.constant 1.000000e+00 : f32
    %37 = vector.broadcast %cst_18 : f32 to vector<2x32xf32>
    %38 = arith.addf %37, %36 : vector<2x32xf32>
    %39 = arith.divf %37, %38 : vector<2x32xf32>
    %40 = vector.extract_strided_slice %28 {offsets = [0, 128], sizes = [2, 32], strides = [1, 1]} : vector<2x384xf32> to vector<2x32xf32>
    %41 = vector.extract_strided_slice %31 {offsets = [0, 128], sizes = [2, 32], strides = [1, 1]} : vector<2x384xf32> to vector<2x32xf32>
    %42 = arith.addf %40, %41 : vector<2x32xf32>
    %43 = arith.negf %42 : vector<2x32xf32>
    %44 = math.exp %43 : vector<2x32xf32>
    %cst_19 = arith.constant 1.000000e+00 : f32
    %45 = vector.broadcast %cst_19 : f32 to vector<2x32xf32>
    %46 = arith.addf %45, %44 : vector<2x32xf32>
    %47 = arith.divf %45, %46 : vector<2x32xf32>
    %48 = vector.extract_strided_slice %28 {offsets = [0, 256], sizes = [2, 32], strides = [1, 1]} : vector<2x384xf32> to vector<2x32xf32>
    %49 = vector.extract_strided_slice %31 {offsets = [0, 256], sizes = [2, 32], strides = [1, 1]} : vector<2x384xf32> to vector<2x32xf32>
    %50 = arith.mulf %39, %49 : vector<2x32xf32>
    %51 = arith.addf %48, %50 : vector<2x32xf32>
    %52 = math.tanh %51 : vector<2x32xf32>
    %cst_20 = arith.constant 1.000000e+00 : f32
    %53 = vector.broadcast %cst_20 : f32 to vector<2x32xf32>
    %54 = arith.subf %53, %47 : vector<2x32xf32>
    %55 = arith.mulf %54, %52 : vector<2x32xf32>
    %56 = arith.mulf %47, %27 : vector<2x32xf32>
    %57 = arith.addf %55, %56 : vector<2x32xf32>
    %58 = vector.extract_strided_slice %26 {offsets = [0, 0, 0], sizes = [1, 2, 32], strides = [1, 1, 1]} : vector<8x2x32xi1> to vector<1x2x32xi1>
    %59 = vector.shape_cast %58 : vector<1x2x32xi1> to vector<2x32xi1>
    %60 = arith.select %59, %57, %27 : vector<2x32xi1>, vector<2x32xf32>
    %61 = vector.extract_strided_slice %7 {offsets = [8, 0], sizes = [2, 384], strides = [1, 1]} : vector<64x384xf32> to vector<2x384xf32>
    %cst_21 = arith.constant dense<0.000000e+00> : vector<2x384xf32>
    %62 = tpu.matmul %60, %8, %cst_21 {dimension_numbers = #tpu.dot_dimension_numbers<[1], [0], [0], [1], [0, 0, 1, 1], [], []>} : vector<2x32xf32>, vector<32x384xf32>, vector<2x384xf32> -> vector<2x384xf32>
    %63 = vector.broadcast %9 : vector<1x384xf32> to vector<2x384xf32>
    %64 = arith.addf %62, %63 : vector<2x384xf32>
    %65 = vector.extract_strided_slice %61 {offsets = [0, 0], sizes = [2, 32], strides = [1, 1]} : vector<2x384xf32> to vector<2x32xf32>
    %66 = vector.extract_strided_slice %64 {offsets = [0, 0], sizes = [2, 32], strides = [1, 1]} : vector<2x384xf32> to vector<2x32xf32>
    %67 = arith.addf %65, %66 : vector<2x32xf32>
    %68 = arith.negf %67 : vector<2x32xf32>
    %69 = math.exp %68 : vector<2x32xf32>
    %cst_22 = arith.constant 1.000000e+00 : f32
    %70 = vector.broadcast %cst_22 : f32 to vector<2x32xf32>
    %71 = arith.addf %70, %69 : vector<2x32xf32>
    %72 = arith.divf %70, %71 : vector<2x32xf32>
    %73 = vector.extract_strided_slice %61 {offsets = [0, 128], sizes = [2, 32], strides = [1, 1]} : vector<2x384xf32> to vector<2x32xf32>
    %74 = vector.extract_strided_slice %64 {offsets = [0, 128], sizes = [2, 32], strides = [1, 1]} : vector<2x384xf32> to vector<2x32xf32>
    %75 = arith.addf %73, %74 : vector<2x32xf32>
    %76 = arith.negf %75 : vector<2x32xf32>
    %77 = math.exp %76 : vector<2x32xf32>
    %cst_23 = arith.constant 1.000000e+00 : f32
    %78 = vector.broadcast %cst_23 : f32 to vector<2x32xf32>
    %79 = arith.addf %78, %77 : vector<2x32xf32>
    %80 = arith.divf %78, %79 : vector<2x32xf32>
    %81 = vector.extract_strided_slice %61 {offsets = [0, 256], sizes = [2, 32], strides = [1, 1]} : vector<2x384xf32> to vector<2x32xf32>
    %82 = vector.extract_strided_slice %64 {offsets = [0, 256], sizes = [2, 32], strides = [1, 1]} : vector<2x384xf32> to vector<2x32xf32>
    %83 = arith.mulf %72, %82 : vector<2x32xf32>
    %84 = arith.addf %81, %83 : vector<2x32xf32>
    %85 = math.tanh %84 : vector<2x32xf32>
    %cst_24 = arith.constant 1.000000e+00 : f32
    %86 = vector.broadcast %cst_24 : f32 to vector<2x32xf32>
    %87 = arith.subf %86, %80 : vector<2x32xf32>
    %88 = arith.mulf %87, %85 : vector<2x32xf32>
    %89 = arith.mulf %80, %60 : vector<2x32xf32>
    %90 = arith.addf %88, %89 : vector<2x32xf32>
    %91 = vector.extract_strided_slice %26 {offsets = [1, 0, 0], sizes = [1, 2, 32], strides = [1, 1, 1]} : vector<8x2x32xi1> to vector<1x2x32xi1>
    %92 = vector.shape_cast %91 : vector<1x2x32xi1> to vector<2x32xi1>
    %93 = arith.select %92, %90, %60 : vector<2x32xi1>, vector<2x32xf32>
    %94 = vector.extract_strided_slice %7 {offsets = [16, 0], sizes = [2, 384], strides = [1, 1]} : vector<64x384xf32> to vector<2x384xf32>
    %cst_25 = arith.constant dense<0.000000e+00> : vector<2x384xf32>
    %95 = tpu.matmul %93, %8, %cst_25 {dimension_numbers = #tpu.dot_dimension_numbers<[1], [0], [0], [1], [0, 0, 1, 1], [], []>} : vector<2x32xf32>, vector<32x384xf32>, vector<2x384xf32> -> vector<2x384xf32>
    %96 = vector.broadcast %9 : vector<1x384xf32> to vector<2x384xf32>
    %97 = arith.addf %95, %96 : vector<2x384xf32>
    %98 = vector.extract_strided_slice %94 {offsets = [0, 0], sizes = [2, 32], strides = [1, 1]} : vector<2x384xf32> to vector<2x32xf32>
    %99 = vector.extract_strided_slice %97 {offsets = [0, 0], sizes = [2, 32], strides = [1, 1]} : vector<2x384xf32> to vector<2x32xf32>
    %100 = arith.addf %98, %99 : vector<2x32xf32>
    %101 = arith.negf %100 : vector<2x32xf32>
    %102 = math.exp %101 : vector<2x32xf32>
    %cst_26 = arith.constant 1.000000e+00 : f32
    %103 = vector.broadcast %cst_26 : f32 to vector<2x32xf32>
    %104 = arith.addf %103, %102 : vector<2x32xf32>
    %105 = arith.divf %103, %104 : vector<2x32xf32>
    %106 = vector.extract_strided_slice %94 {offsets = [0, 128], sizes = [2, 32], strides = [1, 1]} : vector<2x384xf32> to vector<2x32xf32>
    %107 = vector.extract_strided_slice %97 {offsets = [0, 128], sizes = [2, 32], strides = [1, 1]} : vector<2x384xf32> to vector<2x32xf32>
    %108 = arith.addf %106, %107 : vector<2x32xf32>
    %109 = arith.negf %108 : vector<2x32xf32>
    %110 = math.exp %109 : vector<2x32xf32>
    %cst_27 = arith.constant 1.000000e+00 : f32
    %111 = vector.broadcast %cst_27 : f32 to vector<2x32xf32>
    %112 = arith.addf %111, %110 : vector<2x32xf32>
    %113 = arith.divf %111, %112 : vector<2x32xf32>
    %114 = vector.extract_strided_slice %94 {offsets = [0, 256], sizes = [2, 32], strides = [1, 1]} : vector<2x384xf32> to vector<2x32xf32>
    %115 = vector.extract_strided_slice %97 {offsets = [0, 256], sizes = [2, 32], strides = [1, 1]} : vector<2x384xf32> to vector<2x32xf32>
    %116 = arith.mulf %105, %115 : vector<2x32xf32>
    %117 = arith.addf %114, %116 : vector<2x32xf32>
    %118 = math.tanh %117 : vector<2x32xf32>
    %cst_28 = arith.constant 1.000000e+00 : f32
    %119 = vector.broadcast %cst_28 : f32 to vector<2x32xf32>
    %120 = arith.subf %119, %113 : vector<2x32xf32>
    %121 = arith.mulf %120, %118 : vector<2x32xf32>
    %122 = arith.mulf %113, %93 : vector<2x32xf32>
    %123 = arith.addf %121, %122 : vector<2x32xf32>
    %124 = vector.extract_strided_slice %26 {offsets = [2, 0, 0], sizes = [1, 2, 32], strides = [1, 1, 1]} : vector<8x2x32xi1> to vector<1x2x32xi1>
    %125 = vector.shape_cast %124 : vector<1x2x32xi1> to vector<2x32xi1>
    %126 = arith.select %125, %123, %93 : vector<2x32xi1>, vector<2x32xf32>
    %127 = vector.extract_strided_slice %7 {offsets = [24, 0], sizes = [2, 384], strides = [1, 1]} : vector<64x384xf32> to vector<2x384xf32>
    %cst_29 = arith.constant dense<0.000000e+00> : vector<2x384xf32>
    %128 = tpu.matmul %126, %8, %cst_29 {dimension_numbers = #tpu.dot_dimension_numbers<[1], [0], [0], [1], [0, 0, 1, 1], [], []>} : vector<2x32xf32>, vector<32x384xf32>, vector<2x384xf32> -> vector<2x384xf32>
    %129 = vector.broadcast %9 : vector<1x384xf32> to vector<2x384xf32>
    %130 = arith.addf %128, %129 : vector<2x384xf32>
    %131 = vector.extract_strided_slice %127 {offsets = [0, 0], sizes = [2, 32], strides = [1, 1]} : vector<2x384xf32> to vector<2x32xf32>
    %132 = vector.extract_strided_slice %130 {offsets = [0, 0], sizes = [2, 32], strides = [1, 1]} : vector<2x384xf32> to vector<2x32xf32>
    %133 = arith.addf %131, %132 : vector<2x32xf32>
    %134 = arith.negf %133 : vector<2x32xf32>
    %135 = math.exp %134 : vector<2x32xf32>
    %cst_30 = arith.constant 1.000000e+00 : f32
    %136 = vector.broadcast %cst_30 : f32 to vector<2x32xf32>
    %137 = arith.addf %136, %135 : vector<2x32xf32>
    %138 = arith.divf %136, %137 : vector<2x32xf32>
    %139 = vector.extract_strided_slice %127 {offsets = [0, 128], sizes = [2, 32], strides = [1, 1]} : vector<2x384xf32> to vector<2x32xf32>
    %140 = vector.extract_strided_slice %130 {offsets = [0, 128], sizes = [2, 32], strides = [1, 1]} : vector<2x384xf32> to vector<2x32xf32>
    %141 = arith.addf %139, %140 : vector<2x32xf32>
    %142 = arith.negf %141 : vector<2x32xf32>
    %143 = math.exp %142 : vector<2x32xf32>
    %cst_31 = arith.constant 1.000000e+00 : f32
    %144 = vector.broadcast %cst_31 : f32 to vector<2x32xf32>
    %145 = arith.addf %144, %143 : vector<2x32xf32>
    %146 = arith.divf %144, %145 : vector<2x32xf32>
    %147 = vector.extract_strided_slice %127 {offsets = [0, 256], sizes = [2, 32], strides = [1, 1]} : vector<2x384xf32> to vector<2x32xf32>
    %148 = vector.extract_strided_slice %130 {offsets = [0, 256], sizes = [2, 32], strides = [1, 1]} : vector<2x384xf32> to vector<2x32xf32>
    %149 = arith.mulf %138, %148 : vector<2x32xf32>
    %150 = arith.addf %147, %149 : vector<2x32xf32>
    %151 = math.tanh %150 : vector<2x32xf32>
    %cst_32 = arith.constant 1.000000e+00 : f32
    %152 = vector.broadcast %cst_32 : f32 to vector<2x32xf32>
    %153 = arith.subf %152, %146 : vector<2x32xf32>
    %154 = arith.mulf %153, %151 : vector<2x32xf32>
    %155 = arith.mulf %146, %126 : vector<2x32xf32>
    %156 = arith.addf %154, %155 : vector<2x32xf32>
    %157 = vector.extract_strided_slice %26 {offsets = [3, 0, 0], sizes = [1, 2, 32], strides = [1, 1, 1]} : vector<8x2x32xi1> to vector<1x2x32xi1>
    %158 = vector.shape_cast %157 : vector<1x2x32xi1> to vector<2x32xi1>
    %159 = arith.select %158, %156, %126 : vector<2x32xi1>, vector<2x32xf32>
    %160 = vector.extract_strided_slice %7 {offsets = [32, 0], sizes = [2, 384], strides = [1, 1]} : vector<64x384xf32> to vector<2x384xf32>
    %cst_33 = arith.constant dense<0.000000e+00> : vector<2x384xf32>
    %161 = tpu.matmul %159, %8, %cst_33 {dimension_numbers = #tpu.dot_dimension_numbers<[1], [0], [0], [1], [0, 0, 1, 1], [], []>} : vector<2x32xf32>, vector<32x384xf32>, vector<2x384xf32> -> vector<2x384xf32>
    %162 = vector.broadcast %9 : vector<1x384xf32> to vector<2x384xf32>
    %163 = arith.addf %161, %162 : vector<2x384xf32>
    %164 = vector.extract_strided_slice %160 {offsets = [0, 0], sizes = [2, 32], strides = [1, 1]} : vector<2x384xf32> to vector<2x32xf32>
    %165 = vector.extract_strided_slice %163 {offsets = [0, 0], sizes = [2, 32], strides = [1, 1]} : vector<2x384xf32> to vector<2x32xf32>
    %166 = arith.addf %164, %165 : vector<2x32xf32>
    %167 = arith.negf %166 : vector<2x32xf32>
    %168 = math.exp %167 : vector<2x32xf32>
    %cst_34 = arith.constant 1.000000e+00 : f32
    %169 = vector.broadcast %cst_34 : f32 to vector<2x32xf32>
    %170 = arith.addf %169, %168 : vector<2x32xf32>
    %171 = arith.divf %169, %170 : vector<2x32xf32>
    %172 = vector.extract_strided_slice %160 {offsets = [0, 128], sizes = [2, 32], strides = [1, 1]} : vector<2x384xf32> to vector<2x32xf32>
    %173 = vector.extract_strided_slice %163 {offsets = [0, 128], sizes = [2, 32], strides = [1, 1]} : vector<2x384xf32> to vector<2x32xf32>
    %174 = arith.addf %172, %173 : vector<2x32xf32>
    %175 = arith.negf %174 : vector<2x32xf32>
    %176 = math.exp %175 : vector<2x32xf32>
    %cst_35 = arith.constant 1.000000e+00 : f32
    %177 = vector.broadcast %cst_35 : f32 to vector<2x32xf32>
    %178 = arith.addf %177, %176 : vector<2x32xf32>
    %179 = arith.divf %177, %178 : vector<2x32xf32>
    %180 = vector.extract_strided_slice %160 {offsets = [0, 256], sizes = [2, 32], strides = [1, 1]} : vector<2x384xf32> to vector<2x32xf32>
    %181 = vector.extract_strided_slice %163 {offsets = [0, 256], sizes = [2, 32], strides = [1, 1]} : vector<2x384xf32> to vector<2x32xf32>
    %182 = arith.mulf %171, %181 : vector<2x32xf32>
    %183 = arith.addf %180, %182 : vector<2x32xf32>
    %184 = math.tanh %183 : vector<2x32xf32>
    %cst_36 = arith.constant 1.000000e+00 : f32
    %185 = vector.broadcast %cst_36 : f32 to vector<2x32xf32>
    %186 = arith.subf %185, %179 : vector<2x32xf32>
    %187 = arith.mulf %186, %184 : vector<2x32xf32>
    %188 = arith.mulf %179, %159 : vector<2x32xf32>
    %189 = arith.addf %187, %188 : vector<2x32xf32>
    %190 = vector.extract_strided_slice %26 {offsets = [4, 0, 0], sizes = [1, 2, 32], strides = [1, 1, 1]} : vector<8x2x32xi1> to vector<1x2x32xi1>
    %191 = vector.shape_cast %190 : vector<1x2x32xi1> to vector<2x32xi1>
    %192 = arith.select %191, %189, %159 : vector<2x32xi1>, vector<2x32xf32>
    %193 = vector.extract_strided_slice %7 {offsets = [40, 0], sizes = [2, 384], strides = [1, 1]} : vector<64x384xf32> to vector<2x384xf32>
    %cst_37 = arith.constant dense<0.000000e+00> : vector<2x384xf32>
    %194 = tpu.matmul %192, %8, %cst_37 {dimension_numbers = #tpu.dot_dimension_numbers<[1], [0], [0], [1], [0, 0, 1, 1], [], []>} : vector<2x32xf32>, vector<32x384xf32>, vector<2x384xf32> -> vector<2x384xf32>
    %195 = vector.broadcast %9 : vector<1x384xf32> to vector<2x384xf32>
    %196 = arith.addf %194, %195 : vector<2x384xf32>
    %197 = vector.extract_strided_slice %193 {offsets = [0, 0], sizes = [2, 32], strides = [1, 1]} : vector<2x384xf32> to vector<2x32xf32>
    %198 = vector.extract_strided_slice %196 {offsets = [0, 0], sizes = [2, 32], strides = [1, 1]} : vector<2x384xf32> to vector<2x32xf32>
    %199 = arith.addf %197, %198 : vector<2x32xf32>
    %200 = arith.negf %199 : vector<2x32xf32>
    %201 = math.exp %200 : vector<2x32xf32>
    %cst_38 = arith.constant 1.000000e+00 : f32
    %202 = vector.broadcast %cst_38 : f32 to vector<2x32xf32>
    %203 = arith.addf %202, %201 : vector<2x32xf32>
    %204 = arith.divf %202, %203 : vector<2x32xf32>
    %205 = vector.extract_strided_slice %193 {offsets = [0, 128], sizes = [2, 32], strides = [1, 1]} : vector<2x384xf32> to vector<2x32xf32>
    %206 = vector.extract_strided_slice %196 {offsets = [0, 128], sizes = [2, 32], strides = [1, 1]} : vector<2x384xf32> to vector<2x32xf32>
    %207 = arith.addf %205, %206 : vector<2x32xf32>
    %208 = arith.negf %207 : vector<2x32xf32>
    %209 = math.exp %208 : vector<2x32xf32>
    %cst_39 = arith.constant 1.000000e+00 : f32
    %210 = vector.broadcast %cst_39 : f32 to vector<2x32xf32>
    %211 = arith.addf %210, %209 : vector<2x32xf32>
    %212 = arith.divf %210, %211 : vector<2x32xf32>
    %213 = vector.extract_strided_slice %193 {offsets = [0, 256], sizes = [2, 32], strides = [1, 1]} : vector<2x384xf32> to vector<2x32xf32>
    %214 = vector.extract_strided_slice %196 {offsets = [0, 256], sizes = [2, 32], strides = [1, 1]} : vector<2x384xf32> to vector<2x32xf32>
    %215 = arith.mulf %204, %214 : vector<2x32xf32>
    %216 = arith.addf %213, %215 : vector<2x32xf32>
    %217 = math.tanh %216 : vector<2x32xf32>
    %cst_40 = arith.constant 1.000000e+00 : f32
    %218 = vector.broadcast %cst_40 : f32 to vector<2x32xf32>
    %219 = arith.subf %218, %212 : vector<2x32xf32>
    %220 = arith.mulf %219, %217 : vector<2x32xf32>
    %221 = arith.mulf %212, %192 : vector<2x32xf32>
    %222 = arith.addf %220, %221 : vector<2x32xf32>
    %223 = vector.extract_strided_slice %26 {offsets = [5, 0, 0], sizes = [1, 2, 32], strides = [1, 1, 1]} : vector<8x2x32xi1> to vector<1x2x32xi1>
    %224 = vector.shape_cast %223 : vector<1x2x32xi1> to vector<2x32xi1>
    %225 = arith.select %224, %222, %192 : vector<2x32xi1>, vector<2x32xf32>
    %226 = vector.extract_strided_slice %7 {offsets = [48, 0], sizes = [2, 384], strides = [1, 1]} : vector<64x384xf32> to vector<2x384xf32>
    %cst_41 = arith.constant dense<0.000000e+00> : vector<2x384xf32>
    %227 = tpu.matmul %225, %8, %cst_41 {dimension_numbers = #tpu.dot_dimension_numbers<[1], [0], [0], [1], [0, 0, 1, 1], [], []>} : vector<2x32xf32>, vector<32x384xf32>, vector<2x384xf32> -> vector<2x384xf32>
    %228 = vector.broadcast %9 : vector<1x384xf32> to vector<2x384xf32>
    %229 = arith.addf %227, %228 : vector<2x384xf32>
    %230 = vector.extract_strided_slice %226 {offsets = [0, 0], sizes = [2, 32], strides = [1, 1]} : vector<2x384xf32> to vector<2x32xf32>
    %231 = vector.extract_strided_slice %229 {offsets = [0, 0], sizes = [2, 32], strides = [1, 1]} : vector<2x384xf32> to vector<2x32xf32>
    %232 = arith.addf %230, %231 : vector<2x32xf32>
    %233 = arith.negf %232 : vector<2x32xf32>
    %234 = math.exp %233 : vector<2x32xf32>
    %cst_42 = arith.constant 1.000000e+00 : f32
    %235 = vector.broadcast %cst_42 : f32 to vector<2x32xf32>
    %236 = arith.addf %235, %234 : vector<2x32xf32>
    %237 = arith.divf %235, %236 : vector<2x32xf32>
    %238 = vector.extract_strided_slice %226 {offsets = [0, 128], sizes = [2, 32], strides = [1, 1]} : vector<2x384xf32> to vector<2x32xf32>
    %239 = vector.extract_strided_slice %229 {offsets = [0, 128], sizes = [2, 32], strides = [1, 1]} : vector<2x384xf32> to vector<2x32xf32>
    %240 = arith.addf %238, %239 : vector<2x32xf32>
    %241 = arith.negf %240 : vector<2x32xf32>
    %242 = math.exp %241 : vector<2x32xf32>
    %cst_43 = arith.constant 1.000000e+00 : f32
    %243 = vector.broadcast %cst_43 : f32 to vector<2x32xf32>
    %244 = arith.addf %243, %242 : vector<2x32xf32>
    %245 = arith.divf %243, %244 : vector<2x32xf32>
    %246 = vector.extract_strided_slice %226 {offsets = [0, 256], sizes = [2, 32], strides = [1, 1]} : vector<2x384xf32> to vector<2x32xf32>
    %247 = vector.extract_strided_slice %229 {offsets = [0, 256], sizes = [2, 32], strides = [1, 1]} : vector<2x384xf32> to vector<2x32xf32>
    %248 = arith.mulf %237, %247 : vector<2x32xf32>
    %249 = arith.addf %246, %248 : vector<2x32xf32>
    %250 = math.tanh %249 : vector<2x32xf32>
    %cst_44 = arith.constant 1.000000e+00 : f32
    %251 = vector.broadcast %cst_44 : f32 to vector<2x32xf32>
    %252 = arith.subf %251, %245 : vector<2x32xf32>
    %253 = arith.mulf %252, %250 : vector<2x32xf32>
    %254 = arith.mulf %245, %225 : vector<2x32xf32>
    %255 = arith.addf %253, %254 : vector<2x32xf32>
    %256 = vector.extract_strided_slice %26 {offsets = [6, 0, 0], sizes = [1, 2, 32], strides = [1, 1, 1]} : vector<8x2x32xi1> to vector<1x2x32xi1>
    %257 = vector.shape_cast %256 : vector<1x2x32xi1> to vector<2x32xi1>
    %258 = arith.select %257, %255, %225 : vector<2x32xi1>, vector<2x32xf32>
    %259 = vector.extract_strided_slice %7 {offsets = [56, 0], sizes = [2, 384], strides = [1, 1]} : vector<64x384xf32> to vector<2x384xf32>
    %cst_45 = arith.constant dense<0.000000e+00> : vector<2x384xf32>
    %260 = tpu.matmul %258, %8, %cst_45 {dimension_numbers = #tpu.dot_dimension_numbers<[1], [0], [0], [1], [0, 0, 1, 1], [], []>} : vector<2x32xf32>, vector<32x384xf32>, vector<2x384xf32> -> vector<2x384xf32>
    %261 = vector.broadcast %9 : vector<1x384xf32> to vector<2x384xf32>
    %262 = arith.addf %260, %261 : vector<2x384xf32>
    %263 = vector.extract_strided_slice %259 {offsets = [0, 0], sizes = [2, 32], strides = [1, 1]} : vector<2x384xf32> to vector<2x32xf32>
    %264 = vector.extract_strided_slice %262 {offsets = [0, 0], sizes = [2, 32], strides = [1, 1]} : vector<2x384xf32> to vector<2x32xf32>
    %265 = arith.addf %263, %264 : vector<2x32xf32>
    %266 = arith.negf %265 : vector<2x32xf32>
    %267 = math.exp %266 : vector<2x32xf32>
    %cst_46 = arith.constant 1.000000e+00 : f32
    %268 = vector.broadcast %cst_46 : f32 to vector<2x32xf32>
    %269 = arith.addf %268, %267 : vector<2x32xf32>
    %270 = arith.divf %268, %269 : vector<2x32xf32>
    %271 = vector.extract_strided_slice %259 {offsets = [0, 128], sizes = [2, 32], strides = [1, 1]} : vector<2x384xf32> to vector<2x32xf32>
    %272 = vector.extract_strided_slice %262 {offsets = [0, 128], sizes = [2, 32], strides = [1, 1]} : vector<2x384xf32> to vector<2x32xf32>
    %273 = arith.addf %271, %272 : vector<2x32xf32>
    %274 = arith.negf %273 : vector<2x32xf32>
    %275 = math.exp %274 : vector<2x32xf32>
    %cst_47 = arith.constant 1.000000e+00 : f32
    %276 = vector.broadcast %cst_47 : f32 to vector<2x32xf32>
    %277 = arith.addf %276, %275 : vector<2x32xf32>
    %278 = arith.divf %276, %277 : vector<2x32xf32>
    %279 = vector.extract_strided_slice %259 {offsets = [0, 256], sizes = [2, 32], strides = [1, 1]} : vector<2x384xf32> to vector<2x32xf32>
    %280 = vector.extract_strided_slice %262 {offsets = [0, 256], sizes = [2, 32], strides = [1, 1]} : vector<2x384xf32> to vector<2x32xf32>
    %281 = arith.mulf %270, %280 : vector<2x32xf32>
    %282 = arith.addf %279, %281 : vector<2x32xf32>
    %283 = math.tanh %282 : vector<2x32xf32>
    %cst_48 = arith.constant 1.000000e+00 : f32
    %284 = vector.broadcast %cst_48 : f32 to vector<2x32xf32>
    %285 = arith.subf %284, %278 : vector<2x32xf32>
    %286 = arith.mulf %285, %283 : vector<2x32xf32>
    %287 = arith.mulf %278, %258 : vector<2x32xf32>
    %288 = arith.addf %286, %287 : vector<2x32xf32>
    %289 = vector.extract_strided_slice %26 {offsets = [7, 0, 0], sizes = [1, 2, 32], strides = [1, 1, 1]} : vector<8x2x32xi1> to vector<1x2x32xi1>
    %290 = vector.shape_cast %289 : vector<1x2x32xi1> to vector<2x32xi1>
    %291 = arith.select %290, %288, %258 : vector<2x32xi1>, vector<2x32xf32>
    %c16 = arith.constant 16 : index
    %c0_49 = arith.constant 0 : index
    %292 = vector.load %arg5[%c16, %c0_49] : memref<192x128xf32, #tpu.memory_space<vmem>>, vector<32x128xf32>
    %cst_50 = arith.constant dense<0.000000e+00> : vector<2x128xf32>
    %293 = tpu.matmul %291, %292, %cst_50 {dimension_numbers = #tpu.dot_dimension_numbers<[1], [0], [0], [1], [0, 0, 1, 1], [], []>} : vector<2x32xf32>, vector<32x128xf32>, vector<2x128xf32> -> vector<2x128xf32>
    %294 = arith.addf %21, %293 : vector<2x128xf32>
    %295 = math.tanh %294 : vector<2x128xf32>
    %296 = vector.extract_strided_slice %295 {offsets = [0, 0], sizes = [2, 48], strides = [1, 1]} : vector<2x128xf32> to vector<2x48xf32>
    %c56_51 = arith.constant 56 : index
    %c0_52 = arith.constant 0 : index
    %297 = vector.load %arg5[%c56_51, %c0_52] : memref<192x128xf32, #tpu.memory_space<vmem>>, vector<48x128xf32>
    %cst_53 = arith.constant dense<0.000000e+00> : vector<2x128xf32>
    %298 = tpu.matmul %296, %297, %cst_53 {dimension_numbers = #tpu.dot_dimension_numbers<[1], [0], [0], [1], [0, 0, 1, 1], [], []>} : vector<2x48xf32>, vector<48x128xf32>, vector<2x128xf32> -> vector<2x128xf32>
    %c104 = arith.constant 104 : index
    %c0_54 = arith.constant 0 : index
    %299 = vector.load %arg5[%c104, %c0_54] : memref<192x128xf32, #tpu.memory_space<vmem>>, vector<1x128xf32>
    %300 = vector.broadcast %299 : vector<1x128xf32> to vector<2x128xf32>
    %301 = arith.addf %298, %300 : vector<2x128xf32>
    %302 = math.tanh %301 : vector<2x128xf32>
    %303 = vector.extract_strided_slice %302 {offsets = [0, 0], sizes = [2, 32], strides = [1, 1]} : vector<2x128xf32> to vector<2x32xf32>
    %c112 = arith.constant 112 : index
    %c0_55 = arith.constant 0 : index
    %304 = vector.load %arg5[%c112, %c0_55] : memref<192x128xf32, #tpu.memory_space<vmem>>, vector<32x128xf32>
    %cst_56 = arith.constant dense<0.000000e+00> : vector<2x128xf32>
    %305 = tpu.matmul %303, %304, %cst_56 {dimension_numbers = #tpu.dot_dimension_numbers<[1], [0], [0], [1], [0, 0, 1, 1], [], []>} : vector<2x32xf32>, vector<32x128xf32>, vector<2x128xf32> -> vector<2x128xf32>
    %c144 = arith.constant 144 : index
    %c0_57 = arith.constant 0 : index
    %306 = vector.load %arg5[%c144, %c0_57] : memref<192x128xf32, #tpu.memory_space<vmem>>, vector<1x128xf32>
    %307 = vector.broadcast %306 : vector<1x128xf32> to vector<2x128xf32>
    %308 = arith.addf %305, %307 : vector<2x128xf32>
    %cst_58 = arith.constant 0.000000e+00 : f32
    %309 = vector.broadcast %cst_58 : f32 to vector<2x128xf32>
    %310 = arith.maximumf %308, %309 : vector<2x128xf32>
    %311 = vector.extract_strided_slice %310 {offsets = [0, 0], sizes = [2, 32], strides = [1, 1]} : vector<2x128xf32> to vector<2x32xf32>
    %c152 = arith.constant 152 : index
    %c0_59 = arith.constant 0 : index
    %312 = vector.load %arg5[%c152, %c0_59] : memref<192x128xf32, #tpu.memory_space<vmem>>, vector<32x128xf32>
    %cst_60 = arith.constant dense<0.000000e+00> : vector<2x128xf32>
    %313 = tpu.matmul %311, %312, %cst_60 {dimension_numbers = #tpu.dot_dimension_numbers<[1], [0], [0], [1], [0, 0, 1, 1], [], []>} : vector<2x32xf32>, vector<32x128xf32>, vector<2x128xf32> -> vector<2x128xf32>
    %c184 = arith.constant 184 : index
    %c0_61 = arith.constant 0 : index
    %314 = vector.load %arg5[%c184, %c0_61] : memref<192x128xf32, #tpu.memory_space<vmem>>, vector<1x128xf32>
    %315 = vector.broadcast %314 : vector<1x128xf32> to vector<2x128xf32>
    %316 = arith.addf %313, %315 : vector<2x128xf32>
    %c0_62 = arith.constant 0 : index
    %c0_63 = arith.constant 0 : index
    %317 = vector.load %arg6[%c0_62, %c0_63] : memref<2x128xf32, #tpu.memory_space<vmem>>, vector<2x128xf32>
    tpu.vector_store %arg6[%c0_62, %c0_63], %316 {strides = array<i32>} : memref<2x128xf32, #tpu.memory_space<vmem>>, vector<2x128xf32>,
    return
  }
}

</mosaic_0001>

<bundles_post_ra>
// kernel: tpu_custom_call.1
= control target key start
LH: loop header
LB: loop body
LE: loop exit
PB: predicated region body
PF: predicated region fallthrough
CT: control target
= control target key end

     0   :  { %11 = vsyncpa [#allocation3], 0  ;;  %s3222_s0 = inlined_call_operand.vmem [shape: s32[64,1], index: 0, kind: input, shape index: {}]   ;;  %s3223_s1 = inlined_call_operand.vmem [shape: s32[2,1], index: 1, kind: input, shape index: {}]   ;;  %s3224_s2 = inlined_call_operand.vmem [shape: s32[2,1], index: 2, kind: input, shape index: {}]   ;;  %s3225_s3 = inlined_call_operand.vmem [shape: f32[2,16], index: 3, kind: input, shape index: {}]   ;;  %s3226_s4 = inlined_call_operand.hbm [shape: f32[96,384], index: 4, kind: input, shape index: {}]   ;;  %s3227_s5 = inlined_call_operand.hbm [shape: f32[192,128], index: 5, kind: input, shape index: {}]   ;;  %s3228_s6 = inlined_call_operand.hbm [shape: f32[2,128], index: 6, kind: output, shape index: {}]  }
   0x1   :  { %12 = vsyncpa [#allocation6], 0 }
   0x2   :  { %13 = vsyncpa [#allocation4], 0  ;;  %s2751_s21 = smov [#allocation2]  }
   0x3   :  { %s27_s22 = sshll.u32 %s2751_s21, 4  ;;  %s28_s22 = int_to_ptr.vmem [resolvable:$true] %s27_s22 }
   0x4   :  { %s2693_s23 = scalar_lea.vmem %s28_s22, 4608  ;;  %p2698_p1 = scmp.lt.s32.totalorder %s28_s22, %s28_s22 }
   0x5   :  { %p2694_p0 = scmp.ne.s32.totalorder %s28_s22, %s2693_s23  ;;  %p2699_p2 = scmp.lt.s32.totalorder %s2693_s23, %s2693_s23 }
   0x7   :  { %p2700_p3 = por %p2699_p2, %p2698_p1 }
   0x9   :  { %p2701_p4 = pnand %p2700_p3, %p2694_p0 }
   0xb   :  { %2704 = shalt.err (!%p2701_p4)
}
   0xc   :  { %s2752_s24 = smov 384   ;;  %s2753_s25 = smov 24  }
   0xd   :  { %33 = dma.hbm_to_vmem [thread:$0]  %s3226_s4, 4608, %s28_s22, [#allocation3], %s2752_s24, %s2752_s24, %s2753_s25  }
   0xe   :  { %s2754_s28 = smov [#allocation5]  }
   0xf   :  { %s39_s29 = sshll.u32 %s2754_s28, 4  ;;  %s40_s29 = int_to_ptr.vmem [resolvable:$true] %s39_s29 }
  0x10   :  { %s2713_s30 = scalar_lea.vmem %s40_s29, 3072  ;;  %p2718_p6 = scmp.lt.s32.totalorder %s40_s29, %s40_s29 }
  0x11   :  { %p2714_p5 = scmp.ne.s32.totalorder %s40_s29, %s2713_s30  ;;  %p2719_p7 = scmp.lt.s32.totalorder %s2713_s30, %s2713_s30 }
  0x13   :  { %p2720_p8 = por %p2719_p7, %p2718_p6 }
  0x15   :  { %p2721_p9 = pnand %p2720_p8, %p2714_p5 }
  0x17   :  { %2724 = shalt.err (!%p2721_p9)
}
  0x18   :  { %s2755_s7 = smov 128   ;;  %s2756_s8 = smov 8  }
  0x19   :  { %45 = dma.hbm_to_vmem [thread:$0]  %s3227_s5, 3072, %s40_s29, [#allocation6], %s2755_s7, %s2755_s7, %s2756_s8  }
  0x1a   :  { %2745 = dma.done.wait [#allocation3], 4608  }
  0x1b   :  { %2746 = vsyncadd [#allocation3], 4294962688 }
  0x1c   :  { %2747 = dma.done.wait [#allocation6], 3072  }
  0x1d   :  { %2748 = vsyncadd [#allocation6], 4294964224  ;;  %v2757_v0 = vmov 0   ;;  %v2758_v1 = vmov 0.0   ;;  %v54_v2 = vld [vmem:[%s3222_s0 + $0x10] sm:$0xff]  ;;  %v52_v3 = vld [vmem:[%s3222_s0] sm:$0xff]  ;;  %v60_v33 = vlaneseq }
  0x1e   :  { %2600 = vset.pattern.permute.xlu1 %v2757_v0  ;;  %2599 = vset.pattern.permute.xlu0 %v2757_v0  ;;  %vm156_vm0 = vcmask 1041408   ;;  %v55_v4 = vld [vmem:[%s3222_s0 + $0x18] sm:$0xff]  ;;  %v53_v5 = vld [vmem:[%s3222_s0 + $0x8] sm:$0xff]  ;;  %v128_v7 = vld [vmem:[#allocation2 + $0x90] sm:$0x3]  ;;  %vm131_vm1 = vcmask 408576  }
  0x1f   :  { %230 = vmatprep.mubr.f32.mxu0 %v2758_v1  ;;  %69 = vperm.xlu1 %2600, %v54_v2   ;;  %v129_v6 = vld [vmem:[#allocation2 + $0x98] sm:$0x3]  ;;  %v126_v8 = vld [vmem:[#allocation2 + $0x80] sm:$0xff]  ;;  %v127_v11 = vld [vmem:[#allocation2 + $0x88] sm:$0xff]  ;;  %v2840_v34 = vand.u32 127, %v60_v33  ;;  %vm2759_vm10 = vmmov 0  }
  0x20   :  { %63 = vperm.xlu0 %2599, %v52_v3   ;;  %2273 = vmatprep.subr.msk.mxu0 %vm156_vm0, %v129_v6  ;;  %v130_v9 = vld [vmem:[#allocation2 + $0xa0] sm:$0x3]  ;;  %v125_v10 = vld [vmem:[#allocation2 + $0x78] sm:$0xff]  ;;  %v57_v12 = vld [vmem:[%s3222_s0 + $0x28] sm:$0xff]  ;;  %vm409_vm11 = vcmask 130048   ;;  %vm487_vm12 = vcmask 1042432  }
  0x21   :  { %v56_v13 = vld [vmem:[%s3222_s0 + $0x20] sm:$0xff]  ;;  %2274 = vmatpush1.msk.msra.mxu0 %vm156_vm0, %v128_v7  ;;  %2415 = vmatprep.subr.msk.mxu1 %vm156_vm0, %v130_v9  ;;  %v123_v14 = vld [vmem:[#allocation2 + $0x68] sm:$0xff]  ;;  %v124_v16 = vld [vmem:[#allocation2 + $0x70] sm:$0xff]  ;;  %vm483_vm14 = vcmask 23552   ;;  %vm589_vm15 = vcmask 261120  }
  0x22   :  { %186 = vmatprep.subr.mxu0 %v126_v8  ;;  %2416 = vmatpush3.msk.msra.mxu1 %vm156_vm0, %v130_v9  ;;  %v122_v15 = vld [vmem:[#allocation2 + $0x60] sm:$0xff]  ;;  %v120_v17 = vld [vmem:[#allocation2 + $0x50] sm:$0xff]  ;;  %v59_v18 = vld [vmem:[%s3222_s0 + $0x38] sm:$0xff] }
  0x23   :  { %72 = vperm.xlu1 %2600, %v55_v4   ;;  %187 = vmatpush1.msra.mxu0 %v125_v10  ;;  %v58_v19 = vld [vmem:[%s3222_s0 + $0x30] sm:$0xff]  ;;  %v119_v20 = vld [vmem:[#allocation2 + $0x48] sm:$0xff]  ;;  %v121_v21 = vld [vmem:[#allocation2 + $0x58] sm:$0xff] }
  0x24   :  { %66 = vperm.xlu0 %2599, %v53_v5   ;;  %2417 = vmatprep.subr.mxu1 %v127_v11  ;;  %v117_v22 = vld [vmem:[#allocation2 + $0x38] sm:$0xff]  ;;  %v116_v23 = vld [vmem:[#allocation2 + $0x30] sm:$0xff]  ;;  %v118_v24 = vld [vmem:[#allocation2 + $0x40] sm:$0xff] }
  0x25   :  { %188 = vmatprep.subr.mxu0 %v123_v14  ;;  %2418 = vmatpush3.msra.mxu1 %v127_v11  ;;  %v561_v25 = vld [vmem:[%s3224_s2] sm:$0x3]  ;;  %v113_v28 = vld [vmem:[#allocation2 + $0x18] sm:$0xff]  ;;  %v115_v29 = vld [vmem:[#allocation2 + $0x28] sm:$0xff]  ;;  %s2760_s2 = smov [#allocation7]  }
  0x26   :  { %189 = vmatpush1.msra.mxu0 %v122_v15  ;;  %2419 = vmatprep.subr.mxu1 %v124_v16  ;;  %v398_v26 = vld [vmem:[%s3223_s1] sm:$0x3]  ;;  %v111_v30 = vld [vmem:[#allocation2 + $0x8] sm:$0xff]  ;;  %v112_v32 = vld [vmem:[#allocation2 + $0x10] sm:$0xff] }
  0x27   :  { %78 = vperm.xlu1 %2600, %v57_v12   ;;  %190 = vmatprep.subr.mxu0 %v120_v17  ;;  %v114_v27 = vld [vmem:[#allocation2 + $0x20] sm:$0xff]  ;;  %v2849_v39 = vld [vmem:[#allocation2 + $0xe8] sm:$0xff]  ;;  %v2868_v50 = vld [vmem:[#allocation2 + $0xd0] sm:$0xff] }
  0x28   :  { %75 = vperm.xlu0 %2599, %v56_v13   ;;  %2420 = vmatpush3.msra.mxu1 %v124_v16  ;;  %v110_v31 = vld [vmem:[#allocation2] sm:$0xff]  ;;  %v408_v43 = vld [vmem:[#allocation5 + $0x8] sm:$0xff]  ;;  %v2881_v55 = vld [vmem:[#allocation2 + $0xb8] sm:$0xff] }
  0x29   :  { %191 = vmatpush1.msra.mxu0 %v119_v20  ;;  %2421 = vmatprep.subr.mxu1 %v121_v21  ;;  %v2843_v37 = vld [vmem:[#allocation2 + $0x100] sm:$0xff]  ;;  %v405_v59 = vld [vmem:[#allocation5 + $0x30] sm:$0x7]  ;;  %v2899_v60 = vld [vmem:[#allocation2 + $0xf8] sm:$0xff] }
  0x2a   :  { %192 = vmatprep.subr.mxu0 %v117_v22  ;;  %2422 = vmatpush3.msra.mxu1 %v121_v21  ;;  %v407_v45 = vld [vmem:[#allocation5] sm:$0xff]  ;;  %v2907_v61 = vld [vmem:[#allocation2 + $0xf0] sm:$0xff]  ;;  %v2913_v0 = vld [vmem:[#allocation2 + $0xd8] sm:$0xff] }
  0x2b   :  { %84 = vperm.xlu1 %2600, %v59_v18   ;;  %193 = vmatpush1.msra.mxu0 %v116_v23  ;;  %v406_v58 = vld [vmem:[%s3225_s3] sm:$0x3]  ;;  %v2917_v2 = vld [vmem:[#allocation2 + $0xc8] sm:$0xff]  ;;  %v2924_v4 = vld [vmem:[#allocation2 + $0xb0] sm:$0xff]  ;;  %s2255_s3 = sshll.u32 %s2760_s2, 4  ;;  %s2256_s3 = int_to_ptr.vmem [resolvable:$true] %s2255_s3 }
  0x2c   :  { %81 = vperm.xlu0 %2599, %v58_v19   ;;  %2423 = vmatprep.subr.mxu1 %v118_v24  ;;  %v2910_v63 = vld [vmem:[#allocation2 + $0xe0] sm:$0xff]  ;;  %v2928_v5 = vld [vmem:[#allocation2 + $0xa8] sm:$0xff]  ;;  %s2725_s29 = scalar_lea.vmem %s2256_s3, 32  ;;  %p2730_p11 = scmp.lt.s32.totalorder %s2256_s3, %s2256_s3 }
  0x2d   :  { %194 = vmatprep.subr.mxu0 %v114_v27  ;;  %2424 = vmatpush3.msra.mxu1 %v118_v24  ;;  %v2920_v3 = vld [vmem:[#allocation2 + $0xc0] sm:$0xff]  ;;  %p2726_p10 = scmp.ne.s32.totalorder %s2256_s3, %s2725_s29  ;;  %p2731_p12 = scmp.lt.s32.totalorder %s2725_s29, %s2725_s29 }
  0x2e   :  { %195 = vmatpush1.msra.mxu0 %v113_v28  ;;  %2425 = vmatprep.subr.mxu1 %v115_v29 }
  0x2f   :  { %563 = vperm.xlu1 %2600, %v561_v25   ;;  %196 = vmatprep.subr.mxu0 %v111_v30  ;;  %p2732_p13 = por %p2731_p12, %p2730_p11 }
  0x30   :  { %400 = vperm.xlu0 %2599, %v398_v26   ;;  %2426 = vmatpush3.msra.mxu1 %v115_v29  ;;  %v575_v26 = vshrl.u32 %v60_v33, 7 }
  0x31   :  { %197 = vmatpush1.msra.mxu0 %v110_v31  ;;  %2427 = vmatprep.subr.mxu1 %v112_v32  ;;  %p2733_p0 = pnand %p2732_p13, %p2726_p10 }
  0x32   :  { %2428 = vmatpush3.msra.mxu1 %v112_v32  ;;  %2453 = vmatprep.subr.mxu0 %v2758_v1  ;;  %v576_v32 = vsub.s32 0, %v575_v26 }
  0x33   :  { %2441 = vmatprep.subr.mxu1 %v2758_v1 }
  0x9a   :  { %v70_v35 = vpop.permute.xlu1 %69 }
  0x9b   :  { %v64_v36 = vpop.permute.xlu0 %63  ;;  %vm88_vm3 = vcmp.eq.s32.totalorder %v2840_v34, %v70_v35 }
  0x9c   :  { %vm86_vm2 = vcmp.eq.s32.totalorder %v2840_v34, %v64_v36  ;;  %v2267_v42 = vsel %vm88_vm3, 1.0, %v2758_v1  ;;  %v397_v36 = vld [vmem:[#allocation2 + $0x108] ss:$8 sm:$0x7] }
  0x9d   :  { %v2265_v38 = vsel %vm86_vm2, 1.0, %v2758_v1 }
  0x9e   :  { %2275 = vmatmul.mubr.msk.f32.vlgmr.msra.gmra.mxu0 %vm131_vm1, %v2265_v38  ;;  %2429 = vmatprep.mubr.msk.f32.mxu1 %vm131_vm1, %v2265_v38  ;;  %v73_v40 = vpop.permute.xlu1 %72 }
  0x9f   :  { %v67_v41 = vpop.permute.xlu0 %66  ;;  %236 = vmatprep.mubr.f32.mxu0 %v2758_v1  ;;  %2454 = vmatpush3.msra.mxu0 %v2843_v37  ;;  %vm89_vm5 = vcmp.eq.s32.totalorder %v2840_v34, %v73_v40  ;;  %v3000_v40 = vrot.slane %v397_v36, %v576_v32 }
  0xa0   :  { %vm87_vm4 = vcmp.eq.s32.totalorder %v2840_v34, %v67_v41  ;;  %2455 = vmatprep.subr.mxu0 %v2758_v1  ;;  %v2268_v48 = vsel %vm89_vm5, 1.0, %v2758_v1  ;;  %v580_v41 = vsub.s32 1, %v575_v26 }
  0xa1   :  { %v2266_v44 = vsel %vm87_vm4, 1.0, %v2758_v1  ;;  %2456 = vmatpush3.msra.mxu0 %v2849_v39 }
  0xa2   :  { %2276 = vmatmul.mubr.msk.f32.gmra.mxu0 %vm131_vm1, %v2266_v44  ;;  %2430 = vmatmul.mubr.msk.f32.vlgmr.msra.gmra.mxu1 %vm131_vm1, %v2266_v44  ;;  %v79_v46 = vpop.permute.xlu1 %78 }
  0xa3   :  { %2442 = vmatpush3.msra.mxu1 %v408_v43  ;;  %2432 = vmatprep.mubr.msk.f32.mxu1 %vm131_vm1, %v2267_v42  ;;  %v76_v47 = vpop.permute.xlu0 %75  ;;  %vm91_vm7 = vcmp.eq.s32.totalorder %v2840_v34, %v79_v46 }
  0xa4   :  { %vm90_vm6 = vcmp.eq.s32.totalorder %v2840_v34, %v76_v47  ;;  %242 = vmatprep.mubr.f32.mxu0 %v2758_v1  ;;  %2443 = vmatprep.subr.mxu1 %v2758_v1  ;;  %v2270_v53 = vsel %vm91_vm7, 1.0, %v2758_v1 }
  0xa5   :  { %v2269_v49 = vsel %vm90_vm6, 1.0, %v2758_v1  ;;  %2444 = vmatpush3.msra.mxu1 %v407_v45  ;;  %2457 = vmatprep.subr.mxu0 %v2758_v1  ;;  %v3005_v45 = vrot.slane %v397_v36, %v580_v41 }
  0xa6   :  { %2277 = vmatmul.mubr.msk.f32.gmra.mxu0 %vm131_vm1, %v2267_v42  ;;  %2433 = vmatmul.mubr.msk.f32.gmra.mxu1 %vm131_vm1, %v2268_v48  ;;  %v85_v51 = vpop.permute.xlu1 %84 }
  0xa7   :  { %2435 = vmatprep.mubr.msk.f32.mxu1 %vm131_vm1, %v2269_v49  ;;  %v82_v52 = vpop.permute.xlu0 %81  ;;  %248 = vmatprep.mubr.f32.mxu0 %v2758_v1  ;;  %vm93_vm9 = vcmp.eq.s32.totalorder %v2840_v34, %v85_v51 }
  0xa8   :  { %vm92_vm8 = vcmp.eq.s32.totalorder %v2840_v34, %v82_v52  ;;  %2448 = vmatprep.subr.mxu1 %v2758_v1  ;;  %2458 = vmatpush3.msra.mxu0 %v2868_v50  ;;  %v2272_v56 = vsel %vm93_vm9, 1.0, %v2758_v1 }
  0xa9   :  { %v2271_v54 = vsel %vm92_vm8, 1.0, %v2758_v1  ;;  %2459 = vmatprep.subr.mxu0 %v2758_v1  ;;  %vm2008_vm8 = vcmask 392192  }
  0xaa   :  { %2278 = vmatmul.mubr.msk.f32.gmra.mxu0 %vm131_vm1, %v2268_v48  ;;  %2436 = vmatmul.mubr.msk.f32.gmra.mxu1 %vm131_vm1, %v2270_v53  ;;  %v3011_v41 = vpop.permute.xlu1 %563 }
  0xab   :  { %2438 = vmatprep.mubr.msk.f32.mxu1 %vm131_vm1, %v2271_v54  ;;  %254 = vmatprep.mubr.f32.mxu0 %v2758_v1  ;;  %v401_v57 = vpop.permute.xlu0 %400  ;;  %vm565_vm0 = vcmp.gt.s32.totalorder %v3011_v41, 0  ;;  %vm567_vm2 = vcmp.gt.s32.totalorder %v3011_v41, 2  ;;  %vm568_vm3 = vcmp.gt.s32.totalorder %v3011_v41, 3  ;;  %vm569_vm4 = vcmp.gt.s32.totalorder %v3011_v41, 4 }
  0xac   :  { %2460 = vmatpush3.msra.mxu0 %v2881_v55  ;;  %vm402_vm13 = vcmp.eq.s32.totalorder %v2840_v34, %v401_v57  ;;  %v584_v57 = vsub.s32 2, %v575_v26  ;;  %vm570_vm5 = vcmp.gt.s32.totalorder %v3011_v41, 5  ;;  %vm571_vm6 = vcmp.gt.s32.totalorder %v3011_v41, 6 }
  0xad   :  { %2464 = vmatprep.subr.mxu0 %v2758_v1  ;;  %v2292_v62 = vsel %vm402_vm13, 1.0, %v2758_v1  ;;  %vm572_vm7 = vcmp.gt.s32.totalorder %v3011_v41, 7 }
  0xae   :  { %2279 = vmatmul.mubr.msk.f32.gmra.mxu0 %vm131_vm1, %v2269_v49  ;;  %2439 = vmatmul.mubr.msk.f32.gmra.mxu1 %vm131_vm1, %v2272_v56 }
  0xaf   :  { %260 = vmatprep.mubr.f32.mxu0 %v2758_v1  ;;  %2445 = vmatprep.mubr.msk.f32.mxu1 %vm2759_vm10, %v2758_v1 }
  0xb2   :  { %2280 = vmatmul.mubr.msk.f32.gmra.mxu0 %vm131_vm1, %v2270_v53  ;;  %2446 = vmatmul.mubr.msk.f32.vlgmr.msra.gmra.mxu1 %vm409_vm11, %v406_v58  ;;  %v3008_v58 = vrot.slane %v397_v36, %v584_v57 }
  0xb3   :  { %2449 = vmatpush3.msk.msra.mxu1 %vm487_vm12, %v405_v59  ;;  %266 = vmatprep.mubr.f32.mxu0 %v2758_v1 }
  0xb4   :  { %2450 = vmatprep.mubr.msk.f32.mxu1 %vm2759_vm10, %v2758_v1  ;;  %617 = vmatprep.subr.mxu1 %v2899_v60 }
  0xb6   :  { %2281 = vmatmul.mubr.msk.f32.gmra.mxu0 %vm131_vm1, %v2271_v54  ;;  %2451 = vmatmul.mubr.msk.f32.vlgmr.msra.gmra.mxu1 %vm483_vm14, %v2292_v62 }
  0xb7   :  { %618 = vmatpush1.msra.mxu1 %v2907_v61  ;;  %272 = vmatprep.mubr.f32.mxu0 %v2758_v1 }
  0xb8   :  { %619 = vmatprep.subr.mxu1 %v2910_v63  ;;  %657 = vmatprep.mubr.f32.mxu1 %v2758_v1 }
  0xb9   :  { %620 = vmatpush1.msra.mxu1 %v2913_v0 }
  0xba   :  { %621 = vmatprep.subr.mxu1 %v2917_v2  ;;  %2282 = vmatmul.mubr.msk.f32.gmra.mxu0 %vm131_vm1, %v2272_v56  ;;  %vm566_vm1 = vcmp.gt.s32.totalorder %v3011_v41, 1  ;;  %v1998_v41 = vld [vmem:[#allocation5 + $0x40] sm:$0xff] }
  0xbb   :  { %622 = vmatpush1.msra.mxu1 %v2920_v3  ;;  %2461 = vmatprep.mubr.msk.f32.mxu0 %vm2759_vm10, %v2758_v1 }
  0xbc   :  { %623 = vmatprep.subr.mxu1 %v2924_v4 }
  0xbd   :  { %624 = vmatpush1.msra.mxu1 %v2928_v5 }
  0xbe   :  { %658 = vmatmul.mubr.f32.vlgmr.msra.gmra.mxu1 %v2758_v1  ;;  %2462 = vmatmul.mubr.f32.vlgmr.msra.gmra.mxu0 %v2758_v1 }
  0xbf   :  { %783 = vmatprep.subr.mxu1 %v2899_v60  ;;  %2465 = vmatpush3.msra.mxu0 %v2843_v37 }
  0xc0   :  { %784 = vmatpush1.msra.mxu1 %v2907_v61  ;;  %2466 = vmatprep.subr.mxu0 %v2758_v1 }
  0xc1   :  { %785 = vmatprep.subr.mxu1 %v2910_v63  ;;  %2467 = vmatpush3.msra.mxu0 %v2849_v39 }
  0xc2   :  { %786 = vmatpush1.msra.mxu1 %v2913_v0  ;;  %2468 = vmatprep.subr.mxu0 %v2758_v1 }
  0xc3   :  { %787 = vmatprep.subr.mxu1 %v2917_v2  ;;  %2469 = vmatpush3.msra.mxu0 %v2868_v50 }
  0xc4   :  { %788 = vmatpush1.msra.mxu1 %v2920_v3  ;;  %2470 = vmatprep.subr.mxu0 %v2758_v1 }
  0xc5   :  { %789 = vmatprep.subr.mxu1 %v2924_v4  ;;  %823 = vmatprep.mubr.f32.mxu1 %v2758_v1 }
  0xc6   :  { %790 = vmatpush1.msra.mxu1 %v2928_v5  ;;  %2471 = vmatpush3.msra.mxu0 %v2881_v55 }
  0xc7   :  { %2472 = vmatprep.mubr.msk.f32.mxu0 %vm2759_vm10, %v2758_v1  ;;  %949 = vmatprep.subr.mxu1 %v2899_v60 }
  0xc8   :  { %2475 = vmatprep.subr.mxu0 %v2758_v1 }
 0x15e   :  { %v232_v6 = vpop.f32.mrf.mxu0 }
 0x160   :  { %v234_v7 = vpop.f32.mrf.mxu0 }
 0x162   :  { %v2957_v8 = vpop.f32.mrf.mxu0  ;;  %v2959_v9 = vpop.f32.mrf.mxu1 }
 0x164   :  { %v2961_v10 = vpop.f32.mrf.mxu0  ;;  %v345_v11 = vpop.f32.mrf.mxu1 }
 0x166   :  { %v2963_v12 = vpop.f32.mrf.mxu0  ;;  %v2965_v13 = vpop.f32.mrf.mxu1 }
 0x168   :  { %v2967_v14 = vpop.f32.mrf.mxu0  ;;  %v2969_v15 = vpop.f32.mrf.mxu1 }
 0x16a   :  { %v2971_v16 = vpop.f32.mrf.mxu0  ;;  %v2973_v17 = vpop.f32.mrf.mxu1 }
 0x16c   :  { %v2975_v18 = vpop.f32.mrf.mxu0  ;;  %v2977_v19 = vpop.f32.mrf.mxu1 }
 0x16e   :  { %v2979_v20 = vpop.f32.mrf.mxu0  ;;  %v2981_v21 = vpop.f32.mrf.mxu1 }
 0x170   :  { %v2983_v22 = vpop.f32.mrf.mxu0  ;;  %v2985_v23 = vpop.f32.mrf.mxu1 }
 0x172   :  { %v2987_v24 = vpop.f32.mrf.mxu0  ;;  %v479_v25 = vpop.f32.mrf.mxu1 }
 0x174   :  { %v2990_v27 = vpop.f32.mrf.mxu0  ;;  %v2447_v28 = vpop.f32.mrf.mxu1 }
 0x176   :  { %v2992_v29 = vpop.f32.mrf.mxu0  ;;  %v557_v30 = vpop.f32.mrf.mxu1 }
 0x177   :  { %v2994_v31 = vadd.f32 %v557_v30, %v479_v25 }
 0x178   :  { %v2996_v34 = vpop.f32.mrf.mxu0  ;;  %v2452_v35 = vpop.f32.mrf.mxu1 }
 0x17a   :  { %v2998_v38 = vpop.f32.mrf.mxu0 }
 0x17c   :  { %v3002_v42 = vpop.f32.mrf.mxu0 }
 0x17e   :  { %v659_v33 = vpop.f32.mrf.mxu1  ;;  %v730_v43 = vpop.f32.mrf.mxu0 }
 0x17f   :  { %v660_v44 = vadd.f32 %v659_v33, %v3000_v40  ;;  %v731_v25 = vadd.f32 %v730_v43, %v3008_v58 }
 0x180   :  { %v661_v46 = vpop.f32.mrf.mxu1  ;;  %v2463_v47 = vpop.f32.mrf.mxu0 }
 0x181   :  { %v734_v48 = vadd.f32 %v660_v44, %v232_v6  ;;  %v662_v51 = vadd.f32 %v661_v46, %v3005_v45 }
 0x183   :  { %v2296_v49 = vmul.f32 -1.442695, %v734_v48  ;;  %v741_v52 = vadd.f32 %v662_v51, %v234_v7 }
 0x185   :  { %2601 = vpow2.f32 %v2296_v49  ;;  %v2297_v53 = vmul.f32 -1.442695, %v741_v52 }
 0x187   :  { %2603 = vpow2.f32 %v2297_v53 }
 0x192   :  { %v2602_v54 = vpop.eup %2601 }
 0x193   :  { %v738_v56 = vadd.f32 1.0, %v2602_v54 }
 0x194   :  { %v2604_v59 = vpop.eup %2603 }
 0x195   :  { %2605 = vrcp.f32 %v738_v56  ;;  %v745_v62 = vadd.f32 1.0, %v2604_v59 }
 0x197   :  { %2607 = vrcp.f32 %v745_v62 }
 0x1a2   :  { %v2606_v28 = vpop.eup %2605 }
 0x1a3   :  { %v748_v6 = vmul.f32 %v2606_v28, %v731_v25 }
 0x1a4   :  { %v2608_v32 = vpop.eup %2607 }
 0x1a5   :  { %v749_v30 = vadd.f32 %v748_v6, %v345_v11  ;;  %v751_v35 = vsub.f32 1.0, %v2608_v32  ;;  %v753_v44 = vmul.f32 0.0, %v2608_v32 }
 0x1a7   :  { %2609 = vtanh.f32 %v749_v30 }
 0x1b4   :  { %v2610_v7 = vpop.eup %2609 }
 0x1b5   :  { %v752_v33 = vmul.f32 %v2610_v7, %v751_v35 }
 0x1b7   :  { %v754_v26 = vadd.f32 %v753_v44, %v752_v33 }
 0x1b9   :  { %v755_v36 = vsel %vm565_vm0, %v754_v26, 0.0 }
 0x1ba   :  { %2298 = vmatmul.mubr.msk.f32.vlgmr.msra.gmra.mxu1 %vm589_vm15, %v755_v36  ;;  %2473 = vmatmul.mubr.msk.f32.vlgmr.msra.gmra.mxu0 %vm589_vm15, %v755_v36 }
 0x1bb   :  { %950 = vmatpush1.msra.mxu1 %v2907_v61  ;;  %2476 = vmatpush3.msra.mxu0 %v2843_v37 }
 0x1bc   :  { %951 = vmatprep.subr.mxu1 %v2910_v63  ;;  %2477 = vmatprep.subr.mxu0 %v2758_v1 }
 0x1bd   :  { %952 = vmatpush1.msra.mxu1 %v2913_v0  ;;  %2478 = vmatpush3.msra.mxu0 %v2849_v39 }
 0x1be   :  { %953 = vmatprep.subr.mxu1 %v2917_v2  ;;  %2479 = vmatprep.subr.mxu0 %v2758_v1 }
 0x1bf   :  { %954 = vmatpush1.msra.mxu1 %v2920_v3  ;;  %2480 = vmatpush3.msra.mxu0 %v2868_v50 }
 0x1c0   :  { %955 = vmatprep.subr.mxu1 %v2924_v4  ;;  %2481 = vmatprep.subr.mxu0 %v2758_v1 }
 0x1c1   :  { %956 = vmatpush1.msra.mxu1 %v2928_v5  ;;  %989 = vmatprep.mubr.f32.mxu1 %v2758_v1 }
 0x1c2   :  { %2482 = vmatpush3.msra.mxu0 %v2881_v55  ;;  %2483 = vmatprep.mubr.msk.f32.mxu0 %vm2759_vm10, %v2758_v1 }
 0x1c3   :  { %1115 = vmatprep.subr.mxu1 %v2899_v60  ;;  %2486 = vmatprep.subr.mxu0 %v2758_v1 }
 0x27a   :  { %v825_v11 = vpop.f32.mrf.mxu1  ;;  %v896_v43 = vpop.f32.mrf.mxu0 }
 0x27b   :  { %v826_v46 = vadd.f32 %v825_v11, %v3000_v40  ;;  %v897_v25 = vadd.f32 %v896_v43, %v3008_v58 }
 0x27c   :  { %v827_v47 = vpop.f32.mrf.mxu1  ;;  %v2474_v48 = vpop.f32.mrf.mxu0 }
 0x27d   :  { %v900_v49 = vadd.f32 %v826_v46, %v2957_v8  ;;  %v828_v52 = vadd.f32 %v827_v47, %v3005_v45 }
 0x27f   :  { %v2300_v51 = vmul.f32 -1.442695, %v900_v49  ;;  %v907_v53 = vadd.f32 %v828_v52, %v2961_v10 }
 0x281   :  { %2611 = vpow2.f32 %v2300_v51  ;;  %v2301_v54 = vmul.f32 -1.442695, %v907_v53 }
 0x283   :  { %2613 = vpow2.f32 %v2301_v54 }
 0x28e   :  { %v2612_v56 = vpop.eup %2611 }
 0x28f   :  { %v904_v57 = vadd.f32 1.0, %v2612_v56 }
 0x290   :  { %v2614_v59 = vpop.eup %2613 }
 0x291   :  { %2615 = vrcp.f32 %v904_v57  ;;  %v911_v62 = vadd.f32 1.0, %v2614_v59 }
 0x293   :  { %2617 = vrcp.f32 %v911_v62 }
 0x29e   :  { %v2616_v28 = vpop.eup %2615 }
 0x29f   :  { %v914_v6 = vmul.f32 %v2616_v28, %v897_v25 }
 0x2a0   :  { %v2618_v30 = vpop.eup %2617 }
 0x2a1   :  { %v915_v8 = vadd.f32 %v2959_v9, %v914_v6  ;;  %v917_v32 = vsub.f32 1.0, %v2618_v30  ;;  %v919_v10 = vmul.f32 %v2618_v30, %v755_v36 }
 0x2a3   :  { %2619 = vtanh.f32 %v915_v8 }
 0x2b0   :  { %v2620_v35 = vpop.eup %2619 }
 0x2b1   :  { %v918_v7 = vmul.f32 %v2620_v35, %v917_v32 }
 0x2b3   :  { %v920_v33 = vadd.f32 %v919_v10, %v918_v7 }
 0x2b5   :  { %v921_v44 = vsel %vm566_vm1, %v920_v33, %v755_v36 }
 0x2b6   :  { %2302 = vmatmul.mubr.msk.f32.vlgmr.msra.gmra.mxu1 %vm589_vm15, %v921_v44  ;;  %2484 = vmatmul.mubr.msk.f32.vlgmr.msra.gmra.mxu0 %vm589_vm15, %v921_v44 }
 0x2b7   :  { %1116 = vmatpush1.msra.mxu1 %v2907_v61  ;;  %2487 = vmatpush3.msra.mxu0 %v2843_v37 }
 0x2b8   :  { %1117 = vmatprep.subr.mxu1 %v2910_v63  ;;  %2488 = vmatprep.subr.mxu0 %v2758_v1 }
 0x2b9   :  { %1118 = vmatpush1.msra.mxu1 %v2913_v0  ;;  %2489 = vmatpush3.msra.mxu0 %v2849_v39 }
 0x2ba   :  { %1119 = vmatprep.subr.mxu1 %v2917_v2  ;;  %2490 = vmatprep.subr.mxu0 %v2758_v1 }
 0x2bb   :  { %1120 = vmatpush1.msra.mxu1 %v2920_v3  ;;  %2491 = vmatpush3.msra.mxu0 %v2868_v50 }
 0x2bc   :  { %1121 = vmatprep.subr.mxu1 %v2924_v4  ;;  %2492 = vmatprep.subr.mxu0 %v2758_v1 }
 0x2bd   :  { %1122 = vmatpush1.msra.mxu1 %v2928_v5  ;;  %1155 = vmatprep.mubr.f32.mxu1 %v2758_v1 }
 0x2be   :  { %2493 = vmatpush3.msra.mxu0 %v2881_v55  ;;  %2494 = vmatprep.mubr.msk.f32.mxu0 %vm2759_vm10, %v2758_v1 }
 0x2bf   :  { %1281 = vmatprep.subr.mxu1 %v2899_v60  ;;  %2497 = vmatprep.subr.mxu0 %v2758_v1 }
 0x376   :  { %v991_v9 = vpop.f32.mrf.mxu1  ;;  %v1062_v26 = vpop.f32.mrf.mxu0 }
 0x377   :  { %v992_v36 = vadd.f32 %v991_v9, %v3000_v40  ;;  %v1063_v57 = vadd.f32 %v1062_v26, %v3008_v58 }
 0x378   :  { %v993_v11 = vpop.f32.mrf.mxu1  ;;  %v2485_v43 = vpop.f32.mrf.mxu0 }
 0x379   :  { %v1066_v46 = vadd.f32 %v992_v36, %v2963_v12  ;;  %v994_v48 = vadd.f32 %v993_v11, %v3005_v45 }
 0x37b   :  { %v2304_v47 = vmul.f32 -1.442695, %v1066_v46  ;;  %v1073_v49 = vadd.f32 %v994_v48, %v2967_v14 }
 0x37d   :  { %2621 = vpow2.f32 %v2304_v47  ;;  %v2305_v51 = vmul.f32 -1.442695, %v1073_v49 }
 0x37f   :  { %2623 = vpow2.f32 %v2305_v51 }
 0x38a   :  { %v2622_v52 = vpop.eup %2621 }
 0x38b   :  { %v1070_v53 = vadd.f32 1.0, %v2622_v52 }
 0x38c   :  { %v2624_v54 = vpop.eup %2623 }
 0x38d   :  { %2625 = vrcp.f32 %v1070_v53  ;;  %v1077_v56 = vadd.f32 1.0, %v2624_v54 }
 0x38f   :  { %2627 = vrcp.f32 %v1077_v56 }
 0x39a   :  { %v2626_v59 = vpop.eup %2625 }
 0x39b   :  { %v1080_v62 = vmul.f32 %v2626_v59, %v1063_v57 }
 0x39c   :  { %v2628_v25 = vpop.eup %2627 }
 0x39d   :  { %v1081_v12 = vadd.f32 %v1080_v62, %v2969_v15  ;;  %v1083_v28 = vsub.f32 1.0, %v2628_v25  ;;  %v1085_v14 = vmul.f32 %v2628_v25, %v921_v44 }
 0x39f   :  { %2629 = vtanh.f32 %v1081_v12 }
 0x3ac   :  { %v2630_v6 = vpop.eup %2629 }
 0x3ad   :  { %v1084_v8 = vmul.f32 %v2630_v6, %v1083_v28 }
 0x3af   :  { %v1086_v30 = vadd.f32 %v1085_v14, %v1084_v8 }
 0x3b1   :  { %v1087_v32 = vsel %vm567_vm2, %v1086_v30, %v921_v44 }
 0x3b2   :  { %2306 = vmatmul.mubr.msk.f32.vlgmr.msra.gmra.mxu1 %vm589_vm15, %v1087_v32  ;;  %2495 = vmatmul.mubr.msk.f32.vlgmr.msra.gmra.mxu0 %vm589_vm15, %v1087_v32 }
 0x3b3   :  { %1282 = vmatpush1.msra.mxu1 %v2907_v61  ;;  %2498 = vmatpush3.msra.mxu0 %v2843_v37 }
 0x3b4   :  { %1283 = vmatprep.subr.mxu1 %v2910_v63  ;;  %2499 = vmatprep.subr.mxu0 %v2758_v1 }
 0x3b5   :  { %1284 = vmatpush1.msra.mxu1 %v2913_v0  ;;  %2500 = vmatpush3.msra.mxu0 %v2849_v39 }
 0x3b6   :  { %1285 = vmatprep.subr.mxu1 %v2917_v2  ;;  %2501 = vmatprep.subr.mxu0 %v2758_v1 }
 0x3b7   :  { %1286 = vmatpush1.msra.mxu1 %v2920_v3  ;;  %2502 = vmatpush3.msra.mxu0 %v2868_v50 }
 0x3b8   :  { %1287 = vmatprep.subr.mxu1 %v2924_v4  ;;  %2503 = vmatprep.subr.mxu0 %v2758_v1 }
 0x3b9   :  { %1288 = vmatpush1.msra.mxu1 %v2928_v5  ;;  %1321 = vmatprep.mubr.f32.mxu1 %v2758_v1 }
 0x3ba   :  { %2504 = vmatpush3.msra.mxu0 %v2881_v55  ;;  %2505 = vmatprep.mubr.msk.f32.mxu0 %vm2759_vm10, %v2758_v1 }
 0x3bb   :  { %1447 = vmatprep.subr.mxu1 %v2899_v60  ;;  %2508 = vmatprep.subr.mxu0 %v2758_v1 }
 0x472   :  { %v1157_v15 = vpop.f32.mrf.mxu1  ;;  %v1228_v35 = vpop.f32.mrf.mxu0 }
 0x473   :  { %v1158_v7 = vadd.f32 %v1157_v15, %v3000_v40  ;;  %v1229_v49 = vadd.f32 %v1228_v35, %v3008_v58 }
 0x474   :  { %v1159_v10 = vpop.f32.mrf.mxu1  ;;  %v2496_v33 = vpop.f32.mrf.mxu0 }
 0x475   :  { %v1232_v44 = vadd.f32 %v1158_v7, %v2971_v16  ;;  %v1160_v26 = vadd.f32 %v1159_v10, %v3005_v45 }
 0x477   :  { %v2308_v9 = vmul.f32 -1.442695, %v1232_v44  ;;  %v1239_v36 = vadd.f32 %v1160_v26, %v2975_v18 }
 0x479   :  { %2631 = vpow2.f32 %v2308_v9  ;;  %v2309_v11 = vmul.f32 -1.442695, %v1239_v36 }
 0x47b   :  { %2633 = vpow2.f32 %v2309_v11 }
 0x486   :  { %v2632_v43 = vpop.eup %2631 }
 0x487   :  { %v1236_v46 = vadd.f32 1.0, %v2632_v43 }
 0x488   :  { %v2634_v47 = vpop.eup %2633 }
 0x489   :  { %2635 = vrcp.f32 %v1236_v46  ;;  %v1243_v48 = vadd.f32 1.0, %v2634_v47 }
 0x48b   :  { %2637 = vrcp.f32 %v1243_v48 }
 0x496   :  { %v2636_v51 = vpop.eup %2635 }
 0x497   :  { %v1246_v52 = vmul.f32 %v2636_v51, %v1229_v49 }
 0x498   :  { %v2638_v53 = vpop.eup %2637 }
 0x499   :  { %v1247_v16 = vadd.f32 %v2965_v13, %v1246_v52  ;;  %v1249_v54 = vsub.f32 1.0, %v2638_v53  ;;  %v1251_v18 = vmul.f32 %v2638_v53, %v1087_v32 }
 0x49b   :  { %2639 = vtanh.f32 %v1247_v16 }
 0x4a8   :  { %v2640_v56 = vpop.eup %2639 }
 0x4a9   :  { %v1250_v57 = vmul.f32 %v2640_v56, %v1249_v54 }
 0x4ab   :  { %v1252_v59 = vadd.f32 %v1251_v18, %v1250_v57 }
 0x4ad   :  { %v1253_v62 = vsel %vm568_vm3, %v1252_v59, %v1087_v32 }
 0x4ae   :  { %2310 = vmatmul.mubr.msk.f32.vlgmr.msra.gmra.mxu1 %vm589_vm15, %v1253_v62  ;;  %2506 = vmatmul.mubr.msk.f32.vlgmr.msra.gmra.mxu0 %vm589_vm15, %v1253_v62 }
 0x4af   :  { %1448 = vmatpush1.msra.mxu1 %v2907_v61  ;;  %2509 = vmatpush3.msra.mxu0 %v2843_v37 }
 0x4b0   :  { %1449 = vmatprep.subr.mxu1 %v2910_v63  ;;  %2510 = vmatprep.subr.mxu0 %v2758_v1 }
 0x4b1   :  { %1450 = vmatpush1.msra.mxu1 %v2913_v0  ;;  %2511 = vmatpush3.msra.mxu0 %v2849_v39 }
 0x4b2   :  { %1451 = vmatprep.subr.mxu1 %v2917_v2  ;;  %2512 = vmatprep.subr.mxu0 %v2758_v1 }
 0x4b3   :  { %1452 = vmatpush1.msra.mxu1 %v2920_v3  ;;  %2513 = vmatpush3.msra.mxu0 %v2868_v50 }
 0x4b4   :  { %1453 = vmatprep.subr.mxu1 %v2924_v4  ;;  %2514 = vmatprep.subr.mxu0 %v2758_v1 }
 0x4b5   :  { %1454 = vmatpush1.msra.mxu1 %v2928_v5  ;;  %1487 = vmatprep.mubr.f32.mxu1 %v2758_v1 }
 0x4b6   :  { %2515 = vmatpush3.msra.mxu0 %v2881_v55  ;;  %2516 = vmatprep.mubr.msk.f32.mxu0 %vm2759_vm10, %v2758_v1 }
 0x4b7   :  { %1613 = vmatprep.subr.mxu1 %v2899_v60  ;;  %2519 = vmatprep.subr.mxu0 %v2758_v1 }
 0x56e   :  { %v1323_v13 = vpop.f32.mrf.mxu1  ;;  %v1394_v12 = vpop.f32.mrf.mxu0 }
 0x56f   :  { %v1324_v25 = vadd.f32 %v1323_v13, %v3000_v40  ;;  %v1395_v44 = vadd.f32 %v1394_v12, %v3008_v58 }
 0x570   :  { %v1325_v28 = vpop.f32.mrf.mxu1  ;;  %v2507_v6 = vpop.f32.mrf.mxu0 }
 0x571   :  { %v1398_v8 = vadd.f32 %v1324_v25, %v2979_v20  ;;  %v1326_v30 = vadd.f32 %v1325_v28, %v3005_v45 }
 0x573   :  { %v2312_v14 = vmul.f32 -1.442695, %v1398_v8  ;;  %v1405_v32 = vadd.f32 %v1326_v30, %v2983_v22 }
 0x575   :  { %2641 = vpow2.f32 %v2312_v14  ;;  %v2313_v15 = vmul.f32 -1.442695, %v1405_v32 }
 0x577   :  { %2643 = vpow2.f32 %v2313_v15 }
 0x582   :  { %v2642_v35 = vpop.eup %2641 }
 0x583   :  { %v1402_v7 = vadd.f32 1.0, %v2642_v35 }
 0x584   :  { %v2644_v10 = vpop.eup %2643 }
 0x585   :  { %2645 = vrcp.f32 %v1402_v7  ;;  %v1409_v33 = vadd.f32 1.0, %v2644_v10 }
 0x587   :  { %2647 = vrcp.f32 %v1409_v33 }
 0x592   :  { %v2646_v9 = vpop.eup %2645 }
 0x593   :  { %v1412_v26 = vmul.f32 %v2646_v9, %v1395_v44 }
 0x594   :  { %v2648_v36 = vpop.eup %2647 }
 0x595   :  { %v1413_v20 = vadd.f32 %v1412_v26, %v2977_v19  ;;  %v1415_v11 = vsub.f32 1.0, %v2648_v36  ;;  %v1417_v22 = vmul.f32 %v2648_v36, %v1253_v62 }
 0x597   :  { %2649 = vtanh.f32 %v1413_v20 }
 0x5a4   :  { %v2650_v43 = vpop.eup %2649 }
 0x5a5   :  { %v1416_v46 = vmul.f32 %v2650_v43, %v1415_v11 }
 0x5a7   :  { %v1418_v47 = vadd.f32 %v1417_v22, %v1416_v46  ;;  %v1920_v46 = vld [vmem:[#allocation5 + $0x20] sm:$0xff]  ;;  %v1919_v22 = vld [vmem:[#allocation5 + $0x18] sm:$0xff] }
 0x5a9   :  { %v1419_v48 = vsel %vm569_vm4, %v1418_v47, %v1253_v62  ;;  %v1918_v47 = vld [vmem:[#allocation5 + $0x10] sm:$0xff] }
 0x5aa   :  { %2314 = vmatmul.mubr.msk.f32.vlgmr.msra.gmra.mxu1 %vm589_vm15, %v1419_v48  ;;  %2517 = vmatmul.mubr.msk.f32.vlgmr.msra.gmra.mxu0 %vm589_vm15, %v1419_v48 }
 0x5ab   :  { %1614 = vmatpush1.msra.mxu1 %v2907_v61  ;;  %2520 = vmatpush3.msra.mxu0 %v2843_v37 }
 0x5ac   :  { %1615 = vmatprep.subr.mxu1 %v2910_v63  ;;  %2521 = vmatprep.subr.mxu0 %v2758_v1 }
 0x5ad   :  { %1616 = vmatpush1.msra.mxu1 %v2913_v0  ;;  %2522 = vmatpush3.msra.mxu0 %v2849_v39 }
 0x5ae   :  { %1617 = vmatprep.subr.mxu1 %v2917_v2  ;;  %2523 = vmatprep.subr.mxu0 %v2758_v1 }
 0x5af   :  { %1618 = vmatpush1.msra.mxu1 %v2920_v3  ;;  %2524 = vmatpush3.msra.mxu0 %v2868_v50 }
 0x5b0   :  { %1619 = vmatprep.subr.mxu1 %v2924_v4  ;;  %2525 = vmatprep.subr.mxu0 %v2758_v1 }
 0x5b1   :  { %1620 = vmatpush1.msra.mxu1 %v2928_v5  ;;  %1653 = vmatprep.mubr.f32.mxu1 %v2758_v1 }
 0x5b2   :  { %2526 = vmatpush3.msra.mxu0 %v2881_v55  ;;  %2527 = vmatprep.mubr.msk.f32.mxu0 %vm2759_vm10, %v2758_v1 }
 0x5b3   :  { %1779 = vmatprep.subr.mxu1 %v2899_v60  ;;  %2530 = vmatprep.subr.mxu0 %v2758_v1 }
 0x66a   :  { %v1489_v19 = vpop.f32.mrf.mxu1  ;;  %v1560_v49 = vpop.f32.mrf.mxu0 }
 0x66b   :  { %v1490_v51 = vadd.f32 %v1489_v19, %v3000_v40  ;;  %v1561_v12 = vadd.f32 %v1560_v49, %v3008_v58 }
 0x66c   :  { %v1491_v52 = vpop.f32.mrf.mxu1  ;;  %v2518_v16 = vpop.f32.mrf.mxu0 }
 0x66d   :  { %v1564_v53 = vadd.f32 %v1490_v51, %v2987_v24  ;;  %v1492_v56 = vadd.f32 %v1491_v52, %v3005_v45 }
 0x66f   :  { %v2316_v54 = vmul.f32 -1.442695, %v1564_v53  ;;  %v1571_v57 = vadd.f32 %v1492_v56, %v2990_v27 }
 0x671   :  { %2651 = vpow2.f32 %v2316_v54  ;;  %v2317_v18 = vmul.f32 -1.442695, %v1571_v57 }
 0x673   :  { %2653 = vpow2.f32 %v2317_v18 }
 0x67e   :  { %v2652_v59 = vpop.eup %2651 }
 0x67f   :  { %v1568_v60 = vadd.f32 1.0, %v2652_v59 }
 0x680   :  { %v2654_v62 = vpop.eup %2653 }
 0x681   :  { %2655 = vrcp.f32 %v1568_v60  ;;  %v1575_v13 = vadd.f32 1.0, %v2654_v62 }
 0x683   :  { %2657 = vrcp.f32 %v1575_v13 }
 0x68e   :  { %v2656_v25 = vpop.eup %2655 }
 0x68f   :  { %v1578_v28 = vmul.f32 %v2656_v25, %v1561_v12 }
 0x690   :  { %v2658_v6 = vpop.eup %2657 }
 0x691   :  { %v1579_v24 = vadd.f32 %v2973_v17, %v1578_v28  ;;  %v1581_v8 = vsub.f32 1.0, %v2658_v6  ;;  %v1583_v27 = vmul.f32 %v2658_v6, %v1419_v48 }
 0x693   :  { %2659 = vtanh.f32 %v1579_v24 }
 0x6a0   :  { %v2660_v14 = vpop.eup %2659 }
 0x6a1   :  { %v1582_v30 = vmul.f32 %v2660_v14, %v1581_v8  ;;  %v2001_v14 = vld [vmem:[#allocation5 + $0x58] sm:$0xff] }
 0x6a3   :  { %v1584_v32 = vadd.f32 %v1583_v27, %v1582_v30  ;;  %v1999_v30 = vld [vmem:[#allocation5 + $0x48] sm:$0xff]  ;;  %v1997_v27 = vld [vmem:[#allocation5 + $0x38] sm:$0xff] }
 0x6a5   :  { %v1585_v15 = vsel %vm570_vm5, %v1584_v32, %v1419_v48 }
 0x6a6   :  { %2318 = vmatmul.mubr.msk.f32.vlgmr.msra.gmra.mxu1 %vm589_vm15, %v1585_v15  ;;  %2528 = vmatmul.mubr.msk.f32.vlgmr.msra.gmra.mxu0 %vm589_vm15, %v1585_v15 }
 0x6a7   :  { %1780 = vmatpush1.msra.mxu1 %v2907_v61  ;;  %2531 = vmatpush3.msra.mxu0 %v2843_v37 }
 0x6a8   :  { %1781 = vmatprep.subr.mxu1 %v2910_v63  ;;  %2532 = vmatprep.subr.mxu0 %v2758_v1 }
 0x6a9   :  { %1782 = vmatpush1.msra.mxu1 %v2913_v0  ;;  %2533 = vmatpush3.msra.mxu0 %v2849_v39 }
 0x6aa   :  { %1783 = vmatprep.subr.mxu1 %v2917_v2  ;;  %2534 = vmatprep.subr.mxu0 %v2758_v1 }
 0x6ab   :  { %1784 = vmatpush1.msra.mxu1 %v2920_v3  ;;  %2535 = vmatpush3.msra.mxu0 %v2868_v50 }
 0x6ac   :  { %1785 = vmatprep.subr.mxu1 %v2924_v4  ;;  %2536 = vmatprep.subr.mxu0 %v2758_v1 }
 0x6ad   :  { %1786 = vmatpush1.msra.mxu1 %v2928_v5  ;;  %1819 = vmatprep.mubr.f32.mxu1 %v2758_v1 }
 0x6ae   :  { %2537 = vmatpush3.msra.mxu0 %v2881_v55  ;;  %2538 = vmatprep.mubr.msk.f32.mxu0 %vm2759_vm10, %v2758_v1 }
 0x6af   :  { %2541 = vmatprep.subr.mxu1 %v2758_v1  ;;  %2552 = vmatprep.subr.mxu0 %v2758_v1 }
 0x766   :  { %v1655_v37 = vpop.f32.mrf.mxu1  ;;  %v1726_v39 = vpop.f32.mrf.mxu0 }
 0x767   :  { %v1656_v50 = vadd.f32 %v1655_v37, %v3000_v40  ;;  %v1727_v10 = vadd.f32 %v1726_v39, %v3008_v58 }
 0x768   :  { %v1657_v61 = vpop.f32.mrf.mxu1  ;;  %v2529_v63 = vpop.f32.mrf.mxu0 }
 0x769   :  { %v1730_v0 = vadd.f32 %v1656_v50, %v2992_v29  ;;  %v1658_v3 = vadd.f32 %v1657_v61, %v3005_v45  ;;  %v2086_v50 = vld [vmem:[#allocation5 + $0x88] sm:$0xff]  ;;  %v2085_v61 = vld [vmem:[#allocation5 + $0x80] sm:$0xff]  ;;  %v2084_v63 = vld [vmem:[#allocation5 + $0x78] sm:$0xff] }
 0x76b   :  { %v2320_v2 = vmul.f32 -1.442695, %v1730_v0  ;;  %v1737_v55 = vadd.f32 %v1658_v3, %v2996_v34  ;;  %v2083_v0 = vld [vmem:[#allocation5 + $0x70] sm:$0xff] }
 0x76d   :  { %2661 = vpow2.f32 %v2320_v2  ;;  %v2321_v4 = vmul.f32 -1.442695, %v1737_v55  ;;  %v2327_v2 = vld [vmem:[#allocation5 + $0x68] ss:$0 sm:$0xff] }
 0x76f   :  { %2663 = vpow2.f32 %v2321_v4 }
 0x77a   :  { %v2662_v5 = vpop.eup %2661 }
 0x77b   :  { %v1734_v17 = vadd.f32 1.0, %v2662_v5 }
 0x77c   :  { %v2664_v35 = vpop.eup %2663 }
 0x77d   :  { %2665 = vrcp.f32 %v1734_v17  ;;  %v1741_v7 = vadd.f32 1.0, %v2664_v35  ;;  %v2168_v17 = vld [vmem:[#allocation5 + $0xa8] sm:$0xff]  ;;  %v2167_v35 = vld [vmem:[#allocation5 + $0xa0] sm:$0xff] }
 0x77f   :  { %2667 = vrcp.f32 %v1741_v7  ;;  %v2166_v7 = vld [vmem:[#allocation5 + $0x98] sm:$0xff] }
 0x78a   :  { %v2666_v33 = vpop.eup %2665 }
 0x78b   :  { %v1744_v44 = vmul.f32 %v2666_v33, %v1727_v10  ;;  %v2329_v10 = vld [vmem:[#allocation5 + $0x90] ss:$0 sm:$0xff] }
 0x78c   :  { %v2668_v9 = vpop.eup %2667 }
 0x78d   :  { %v1745_v29 = vadd.f32 %v1744_v44, %v2985_v23  ;;  %v1747_v26 = vsub.f32 1.0, %v2668_v9  ;;  %v1749_v34 = vmul.f32 %v2668_v9, %v1585_v15  ;;  %v1921_v23 = vld [vmem:[#allocation5 + $0x28] sm:$0xff] }
 0x78f   :  { %2669 = vtanh.f32 %v1745_v29 }
 0x79c   :  { %v2670_v20 = vpop.eup %2669 }
 0x79d   :  { %v1748_v36 = vmul.f32 %v2670_v20, %v1747_v26  ;;  %v2331_v26 = vld [vmem:[#allocation5 + $0xb8] ss:$0 sm:$0xff] }
 0x79f   :  { %v1750_v11 = vadd.f32 %v1749_v34, %v1748_v36 }
 0x7a1   :  { %v1751_v43 = vsel %vm571_vm6, %v1750_v11, %v1585_v15 }
 0x7a2   :  { %2322 = vmatmul.mubr.msk.f32.vlgmr.msra.gmra.mxu1 %vm589_vm15, %v1751_v43  ;;  %2539 = vmatmul.mubr.msk.f32.vlgmr.msra.gmra.mxu0 %vm589_vm15, %v1751_v43 }
 0x7a3   :  { %2549 = vmatprep.mubr.msk.f32.mxu1 %vm2759_vm10, %v2758_v1  ;;  %2564 = vmatprep.mubr.msk.f32.mxu0 %vm2759_vm10, %v2758_v1 }
 0x7a4   :  { %2542 = vmatpush3.msra.mxu1 %v1921_v23 }
 0x7a5   :  { %2543 = vmatprep.subr.mxu1 %v2758_v1 }
 0x7a6   :  { %2544 = vmatpush3.msra.mxu1 %v1920_v46 }
 0x7a7   :  { %2545 = vmatprep.subr.mxu1 %v2758_v1 }
 0x7a8   :  { %2546 = vmatpush3.msra.mxu1 %v1919_v22 }
 0x7a9   :  { %2547 = vmatprep.subr.mxu1 %v2758_v1 }
 0x7aa   :  { %2548 = vmatpush3.msra.mxu1 %v1918_v47 }
 0x7ab   :  { %2567 = vmatprep.subr.mxu1 %v2758_v1 }
 0x862   :  { %v1821_v48 = vpop.f32.mrf.mxu1  ;;  %v1892_v19 = vpop.f32.mrf.mxu0 }
 0x863   :  { %v1822_v49 = vadd.f32 %v1821_v48, %v3000_v40  ;;  %v1893_v13 = vadd.f32 %v1892_v19, %v3008_v58  ;;  %v2002_v58 = vld [vmem:[#allocation5 + $0x60] sm:$0xff] }
 0x864   :  { %v1823_v51 = vpop.f32.mrf.mxu1  ;;  %v2540_v52 = vpop.f32.mrf.mxu0  ;;  %2553 = vmatpush3.msra.mxu0 %v2002_v58 }
 0x865   :  { %v1896_v16 = vadd.f32 %v1822_v49, %v2998_v38  ;;  %v1824_v54 = vadd.f32 %v1823_v51, %v3005_v45  ;;  %2554 = vmatprep.subr.mxu0 %v2758_v1 }
 0x866   :  { %2555 = vmatpush3.msra.mxu0 %v2001_v14 }
 0x867   :  { %v2324_v53 = vmul.f32 -1.442695, %v1896_v16  ;;  %v1903_v56 = vadd.f32 %v1824_v54, %v3002_v42  ;;  %2556 = vmatprep.subr.mxu0 %v2758_v1 }
 0x869   :  { %2671 = vpow2.f32 %v2324_v53  ;;  %v2325_v57 = vmul.f32 -1.442695, %v1903_v56 }
 0x86b   :  { %2673 = vpow2.f32 %v2325_v57 }
 0x876   :  { %v2672_v18 = vpop.eup %2671 }
 0x877   :  { %v1900_v59 = vadd.f32 1.0, %v2672_v18 }
 0x878   :  { %v2674_v60 = vpop.eup %2673 }
 0x879   :  { %2675 = vrcp.f32 %v1900_v59  ;;  %v1907_v62 = vadd.f32 1.0, %v2674_v60 }
 0x87b   :  { %2677 = vrcp.f32 %v1907_v62 }
 0x886   :  { %v2676_v40 = vpop.eup %2675 }
 0x887   :  { %v1910_v12 = vmul.f32 %v2676_v40, %v1893_v13 }
 0x888   :  { %v2678_v25 = vpop.eup %2677 }
 0x889   :  { %v1911_v38 = vadd.f32 %v2981_v21, %v1910_v12  ;;  %v1913_v45 = vsub.f32 1.0, %v2678_v25  ;;  %v1915_v42 = vmul.f32 %v2678_v25, %v1751_v43  ;;  %v2000_v21 = vld [vmem:[#allocation5 + $0x50] sm:$0xff] }
 0x88a   :  { %2557 = vmatpush3.msra.mxu0 %v2000_v21 }
 0x88b   :  { %2679 = vtanh.f32 %v1911_v38  ;;  %2558 = vmatprep.subr.mxu0 %v2758_v1 }
 0x88c   :  { %2559 = vmatpush3.msra.mxu0 %v1999_v30 }
 0x88d   :  { %2560 = vmatprep.subr.mxu0 %v2758_v1 }
 0x88e   :  { %2561 = vmatpush3.msra.mxu0 %v1998_v41 }
 0x88f   :  { %2562 = vmatprep.subr.mxu0 %v2758_v1 }
 0x890   :  { %2563 = vmatpush3.msra.mxu0 %v1997_v27 }
 0x891   :  { %2578 = vmatprep.subr.mxu0 %v2758_v1 }
 0x898   :  { %v2680_v28 = vpop.eup %2679 }
 0x899   :  { %v1914_v24 = vmul.f32 %v2680_v28, %v1913_v45 }
 0x89b   :  { %v1916_v6 = vadd.f32 %v1915_v42, %v1914_v24 }
 0x89d   :  { %v1917_v8 = vsel %vm572_vm7, %v1916_v6, %v1751_v43 }
 0x89e   :  { %2550 = vmatmul.mubr.msk.f32.vlgmr.msra.gmra.mxu1 %vm589_vm15, %v1917_v8 }
 0x89f   :  { %2575 = vmatprep.mubr.msk.f32.mxu1 %vm2759_vm10, %v2758_v1  ;;  %2568 = vmatpush3.msra.mxu1 %v2086_v50 }
 0x8a0   :  { %2569 = vmatprep.subr.mxu1 %v2758_v1 }
 0x8a1   :  { %2570 = vmatpush3.msra.mxu1 %v2085_v61 }
 0x8a2   :  { %2571 = vmatprep.subr.mxu1 %v2758_v1 }
 0x8a3   :  { %2572 = vmatpush3.msra.mxu1 %v2084_v63 }
 0x8a4   :  { %2573 = vmatprep.subr.mxu1 %v2758_v1 }
 0x8a5   :  { %2574 = vmatpush3.msra.mxu1 %v2083_v0 }
 0x95e   :  { %v1991_v32 = vpop.f32.mrf.mxu1 }
 0x95f   :  { %v1995_v15 = vadd.f32 %v1991_v32, %v2994_v31  ;;  %v2169_v31 = vld [vmem:[#allocation5 + $0xb0] sm:$0xff] }
 0x960   :  { %v2551_v37 = vpop.f32.mrf.mxu1 }
 0x961   :  { %2681 = vtanh.f32 %v1995_v15 }
 0x96e   :  { %v2682_v39 = vpop.eup %2681 }
 0x96f   :  { %2565 = vmatmul.mubr.msk.f32.vlgmr.msra.gmra.mxu0 %vm2008_vm8, %v2682_v39 }
 0x970   :  { %2586 = vmatprep.mubr.msk.f32.mxu0 %vm2759_vm10, %v2758_v1  ;;  %2579 = vmatpush3.msra.mxu0 %v2169_v31 }
 0x971   :  { %2580 = vmatprep.subr.mxu0 %v2758_v1 }
 0x972   :  { %2581 = vmatpush3.msra.mxu0 %v2168_v17 }
 0x973   :  { %2582 = vmatprep.subr.mxu0 %v2758_v1 }
 0x974   :  { %2583 = vmatpush3.msra.mxu0 %v2167_v35 }
 0x975   :  { %2584 = vmatprep.subr.mxu0 %v2758_v1 }
 0x976   :  { %2585 = vmatpush3.msra.mxu0 %v2166_v7 }
 0xa2f   :  { %v2078_v3 = vpop.f32.mrf.mxu0 }
 0xa30   :  { %v2079_v55 = vadd.f32 %v2327_v2, %v2078_v3 }
 0xa31   :  { %v2566_v4 = vpop.f32.mrf.mxu0 }
 0xa32   :  { %2683 = vtanh.f32 %v2079_v55 }
 0xa3f   :  { %v2684_v5 = vpop.eup %2683 }
 0xa40   :  { %2576 = vmatmul.mubr.msk.f32.vlgmr.msra.gmra.mxu1 %vm589_vm15, %v2684_v5 }
 0xb00   :  { %v2161_v33 = vpop.f32.mrf.mxu1 }
 0xb01   :  { %v2162_v44 = vadd.f32 %v2329_v10, %v2161_v33 }
 0xb02   :  { %v2577_v29 = vpop.f32.mrf.mxu1 }
 0xb03   :  { %v2165_v9 = vmax.f32 %v2162_v44, 0.0 }
 0xb05   :  { %2587 = vmatmul.mubr.msk.f32.vlgmr.msra.gmra.mxu0 %vm589_vm15, %v2165_v9 }
 0xbc5   :  { %v2244_v20 = vpop.f32.mrf.mxu0 }
 0xbc6   :  { %v2245_v36 = vadd.f32 %v2331_v26, %v2244_v20 }
 0xbc7   :  { %v2588_v34 = vpop.f32.mrf.mxu0 }
 0xbc8   :  { %2248 = vst [vmem:[#allocation7] sm:$0x3] %v2245_v36 }
 0xbc9   :  { %2736 = shalt.err (!%p2733_p0)
}
 0xbca   :  { %2258 = dma.vmem_to_hbm [thread:$0]  %s2256_s3, 32, %s3228_s6, [#allocation4]  }
 0xbcb   :  { %2749 = dma.done.wait [#allocation4], 32  }
 0xbcc   :  { %2750 = vsyncadd [#allocation4], 4294967264 }
 0xbcd   :  { %2262 = vsyncpa [#allocation3], 1 }
 0xbce   :  { %2263 = vsyncpa [#allocation6], 1 }
 0xbcf   :  { %2264 = vsyncpa [#allocation4], 1 }

</bundles_post_ra>
